<compile_context>
chip_gen: v6e
topology: v6e:2x2x1
jax: 0.10.0
libtpu: 0.0.40
codegen_flags: <defaults>
</compile_context>

<pallas_src>
import jax
import jax.numpy as jnp
from jax.experimental import pallas as pl
from jax.experimental.pallas import tpu as pltpu


def mlp_lenet_mnist_kernel(x_ref, w1_ref, b1_ref, w2_ref, b2_ref, o_ref):
    """Fused: fc1 -> relu -> (dropout p=0 identity) -> fc2 -> log_softmax."""
    # fc1: bf16 inputs, f32 MXU accumulation.
    h = jnp.dot(x_ref[...], w1_ref[...], preferred_element_type=jnp.float32)
    h = jnp.maximum(h + b1_ref[...], 0.0)          # (tile_b, hidden), f32

    # TODO(synk): dropout with p>0 in training mode would need pltpu.prng_*;
    # the module default (p=0.0 / eval) is an identity, which is what we do.

    # fc2: cast activations to bf16 for the MXU, accumulate in f32.
    logits = jnp.dot(h.astype(jnp.bfloat16), w2_ref[...],
                     preferred_element_type=jnp.float32)
    # b2 is padded with -1e30 on the padded class lanes, so padded logits are
    # effectively -inf and contribute exactly 0 to the softmax normalizer.
    logits = logits + b2_ref[...]                   # (tile_b, 128)

    # Numerically stable log_softmax over the (lane) class axis.
    m = jnp.max(logits, axis=-1, keepdims=True)
    shifted = logits - m
    lse = jnp.log(jnp.sum(jnp.exp(shifted), axis=-1, keepdims=True))
    o_ref[...] = (shifted - lse).astype(o_ref.dtype)


def mlp_lenet_mnist_forward(x_nchw, w1, b1, w2, b2):
    """x_nchw: (B, C, H, W) float32. Returns (B, no_classes) log-probs (f32)."""
    B = x_nchw.shape[0]
    ngf = x_nchw.shape[1] * x_nchw.shape[2] * x_nchw.shape[3]
    hidden = w1.shape[1]
    no_classes = w2.shape[1]

    LANE, SUBLANE = 128, 8

    # ---- padding / tiling decisions -------------------------------------
    c_pad = ((no_classes + LANE - 1) // LANE) * LANE          # 10 -> 128
    b_pad = ((B + SUBLANE - 1) // SUBLANE) * SUBLANE          # 2  -> 8
    tile_b = min(b_pad, 512)                                  # batch tile
    b_pad = ((b_pad + tile_b - 1) // tile_b) * tile_b         # exact grid

    # ---- host-side dtype / layout prep (done once, outside the kernel) --
    x_flat = x_nchw.reshape(B, ngf).astype(jnp.bfloat16)      # == torch .view
    x_p = jnp.zeros((b_pad, ngf), jnp.bfloat16).at[:B].set(x_flat)

    w1_bf = w1.astype(jnp.bfloat16)                           # (ngf, hidden)
    b1_2d = b1.reshape(1, hidden).astype(jnp.float32)

    w2_p = jnp.zeros((hidden, c_pad), jnp.bfloat16)
    w2_p = w2_p.at[:, :no_classes].set(w2.astype(jnp.bfloat16))
    # Padded class lanes get a huge negative bias -> masked out of softmax.
    b2_p = jnp.full((1, c_pad), -1e30, jnp.float32)
    b2_p = b2_p.at[0, :no_classes].set(b2.astype(jnp.float32))

    grid = (b_pad // tile_b,)

    cost = pl.CostEstimate(
        flops=2 * b_pad * ngf * hidden + 2 * b_pad * hidden * c_pad,
        transcendentals=b_pad * c_pad,              # exp in log_softmax
        bytes_accessed=(x_p.size * 2 + w1_bf.size * 2 + w2_p.size * 2
                        + b1_2d.size * 4 + b2_p.size * 4 + b_pad * c_pad * 4),
    )

    out_p = pl.pallas_call(
        mlp_lenet_mnist_kernel,
        out_shape=jax.ShapeDtypeStruct((b_pad, c_pad), jnp.float32),
        grid=grid,
        in_specs=[
            pl.BlockSpec((tile_b, ngf), lambda i: (i, 0)),      # x: tiled batch
            pl.BlockSpec((ngf, hidden), lambda i: (0, 0)),      # w1: resident
            pl.BlockSpec((1, hidden), lambda i: (0, 0)),        # b1: resident
            pl.BlockSpec((hidden, c_pad), lambda i: (0, 0)),    # w2: resident
            pl.BlockSpec((1, c_pad), lambda i: (0, 0)),         # b2: resident
        ],
        out_specs=pl.BlockSpec((tile_b, c_pad), lambda i: (i, 0)),
        compiler_params=pltpu.CompilerParams(
            dimension_semantics=("parallel",),      # batch tiles are independent
            # Comfortably above actual use, below v7x's 64 MiB physical VMEM.
            vmem_limit_bytes=48 * 1024 * 1024,
        ),
        cost_estimate=cost,
    )(x_p, w1_bf, b1_2d, w2_p, b2_p)

    # Slice away batch + class padding.
    return out_p[:B, :no_classes]


def reference_forward_bf16(x_nchw, w1, b1, w2, b2):
    """Pure-JAX reference with the same bf16-in / f32-accumulate recipe."""
    B = x_nchw.shape[0]
    x = x_nchw.reshape(B, -1).astype(jnp.bfloat16)
    h = jnp.dot(x, w1.astype(jnp.bfloat16), preferred_element_type=jnp.float32)
    h = jnp.maximum(h + b1, 0.0)
    logits = jnp.dot(h.astype(jnp.bfloat16), w2.astype(jnp.bfloat16),
                     preferred_element_type=jnp.float32) + b2
    return jax.nn.log_softmax(logits, axis=-1)


def reference_forward_f32(x_nchw, w1, b1, w2, b2):
    """Full-precision reference (sanity check on bf16 error)."""
    B = x_nchw.shape[0]
    x = x_nchw.reshape(B, -1)
    h = jnp.maximum(x @ w1 + b1, 0.0)
    logits = h @ w2 + b2
    return jax.nn.log_softmax(logits, axis=-1)


if __name__ == "__main__":
    # Module config: input_nc=4, input_width=16, input_height=16, no_classes=10
    B, C, H, W = 2, 4, 16, 16
    ngf = C * H * W                      # 1024
    hidden = int(round(ngf / 1.6))       # 640  (LeNet-MNIST MLP head)
    no_classes = 10

    key = jax.random.PRNGKey(0)
    kx, k1, k2, k3, k4 = jax.random.split(key, 5)

    x = jax.random.normal(kx, (B, C, H, W), dtype=jnp.float32)

    # PyTorch-style uniform(-1/sqrt(fan_in), 1/sqrt(fan_in)) init.
    bound1 = 1.0 / jnp.sqrt(jnp.float32(ngf))
    w1 = jax.random.uniform(k1, (ngf, hidden), jnp.float32, -bound1, bound1)
    b1 = jax.random.uniform(k2, (hidden,), jnp.float32, -bound1, bound1)
    bound2 = 1.0 / jnp.sqrt(jnp.float32(hidden))
    w2 = jax.random.uniform(k3, (hidden, no_classes), jnp.float32, -bound2, bound2)
    b2 = jax.random.uniform(k4, (no_classes,), jnp.float32, -bound2, bound2)

    out = mlp_lenet_mnist_forward(x, w1, b1, w2, b2)
    out = jax.block_until_ready(out)
    assert out.shape == (B, no_classes)

    ref_bf16 = reference_forward_bf16(x, w1, b1, w2, b2)
    ref_f32 = reference_forward_f32(x, w1, b1, w2, b2)

    assert jnp.allclose(out, ref_bf16, atol=2e-3, rtol=2e-3), \
        "mismatch vs bf16-matched JAX reference"
    assert jnp.allclose(out, ref_f32, atol=5e-2, rtol=5e-2), \
        "mismatch vs f32 JAX reference (bf16 error too large)"
    assert bool(jnp.all(jnp.isfinite(out))), "non-finite log-probs"

    print("KERNEL_OK")
</pallas_src>

<mosaic_0001>
module attributes {stable_mosaic.version = 11 : i64} {
  func.func @mlp_lenet_mnist_kernel(%arg0: i32, %arg1: memref<8x1024xbf16, #tpu.memory_space<vmem>>, %arg2: memref<1024x640xbf16, #tpu.memory_space<vmem>>, %arg3: memref<1x640xf32, #tpu.memory_space<vmem>>, %arg4: memref<640x128xbf16, #tpu.memory_space<vmem>>, %arg5: memref<1x128xf32, #tpu.memory_space<vmem>>, %arg6: memref<8x128xf32, #tpu.memory_space<vmem>>) attributes {dimension_semantics = [#tpu.dimension_semantics<parallel>], iteration_bounds = array<i64: 1>, scalar_prefetch = 0 : i64, scratch_operands = 0 : i64, tpu.core_type = #tpu.core_type<tc>, window_params = [{transform_indices = @transform_0, window_bounds = array<i64: 8, 1024>}, {pipeline_mode = #tpu.pipeline_mode<synchronous>, transform_indices = @transform_1, window_bounds = array<i64: 1024, 640>}, {pipeline_mode = #tpu.pipeline_mode<synchronous>, transform_indices = @transform_2, window_bounds = array<i64: 1, 640>}, {pipeline_mode = #tpu.pipeline_mode<synchronous>, transform_indices = @transform_3, window_bounds = array<i64: 640, 128>}, {pipeline_mode = #tpu.pipeline_mode<synchronous>, transform_indices = @transform_4, window_bounds = array<i64: 1, 128>}, {transform_indices = @transform_5, window_bounds = array<i64: 8, 128>}]} {
    %c0 = arith.constant 0 : index
    %c0_0 = arith.constant 0 : index
    %0 = vector.load %arg1[%c0, %c0_0] : memref<8x1024xbf16, #tpu.memory_space<vmem>>, vector<8x1024xbf16>
    %c0_1 = arith.constant 0 : index
    %c0_2 = arith.constant 0 : index
    %1 = vector.load %arg2[%c0_1, %c0_2] : memref<1024x640xbf16, #tpu.memory_space<vmem>>, vector<1024x640xbf16>
    %cst = arith.constant dense<0.000000e+00> : vector<8x640xf32>
    %2 = tpu.matmul %0, %1, %cst {dimension_numbers = #tpu.dot_dimension_numbers<[1], [0], [0], [1], [0, 0, 1, 1], [], []>} : vector<8x1024xbf16>, vector<1024x640xbf16>, vector<8x640xf32> -> vector<8x640xf32>
    %c0_3 = arith.constant 0 : index
    %c0_4 = arith.constant 0 : index
    %3 = vector.load %arg3[%c0_3, %c0_4] : memref<1x640xf32, #tpu.memory_space<vmem>>, vector<1x640xf32>
    %4 = vector.broadcast %3 : vector<1x640xf32> to vector<8x640xf32>
    %5 = arith.addf %2, %4 : vector<8x640xf32>
    %cst_5 = arith.constant 0.000000e+00 : f32
    %6 = vector.broadcast %cst_5 : f32 to vector<8x640xf32>
    %7 = arith.maximumf %5, %6 : vector<8x640xf32>
    %8 = arith.truncf %7 : vector<8x640xf32> to vector<8x640xbf16>
    %c0_6 = arith.constant 0 : index
    %c0_7 = arith.constant 0 : index
    %9 = vector.load %arg4[%c0_6, %c0_7] : memref<640x128xbf16, #tpu.memory_space<vmem>>, vector<640x128xbf16>
    %cst_8 = arith.constant dense<0.000000e+00> : vector<8x128xf32>
    %10 = tpu.matmul %8, %9, %cst_8 {dimension_numbers = #tpu.dot_dimension_numbers<[1], [0], [0], [1], [0, 0, 1, 1], [], []>} : vector<8x640xbf16>, vector<640x128xbf16>, vector<8x128xf32> -> vector<8x128xf32>
    %c0_9 = arith.constant 0 : index
    %c0_10 = arith.constant 0 : index
    %11 = vector.load %arg5[%c0_9, %c0_10] : memref<1x128xf32, #tpu.memory_space<vmem>>, vector<1x128xf32>
    %12 = vector.broadcast %11 : vector<1x128xf32> to vector<8x128xf32>
    %13 = arith.addf %10, %12 : vector<8x128xf32>
    %cst_11 = arith.constant dense<0xFF800000> : vector<8xf32>
    %14 = vector.multi_reduction <maximumf>, %13, %cst_11 [1] : vector<8x128xf32> to vector<8xf32>
    %15 = vector.shape_cast %14 : vector<8xf32> to vector<8x1xf32>
    %16 = vector.broadcast %15 : vector<8x1xf32> to vector<8x128xf32>
    %17 = arith.subf %13, %16 : vector<8x128xf32>
    %18 = math.exp %17 : vector<8x128xf32>
    %cst_12 = arith.constant dense<0.000000e+00> : vector<8xf32>
    %19 = vector.multi_reduction <add>, %18, %cst_12 [1] : vector<8x128xf32> to vector<8xf32>
    %20 = vector.shape_cast %19 : vector<8xf32> to vector<8x1xf32>
    %21 = math.log %20 : vector<8x1xf32>
    %22 = vector.broadcast %21 : vector<8x1xf32> to vector<8x128xf32>
    %23 = arith.subf %17, %22 : vector<8x128xf32>
    %c0_13 = arith.constant 0 : index
    %c0_14 = arith.constant 0 : index
    %24 = vector.load %arg6[%c0_13, %c0_14] : memref<8x128xf32, #tpu.memory_space<vmem>>, vector<8x128xf32>
    tpu.vector_store %arg6[%c0_13, %c0_14], %23 {strides = array<i32>} : memref<8x128xf32, #tpu.memory_space<vmem>>, vector<8x128xf32>,
    return
  }
  func.func @transform_0(%arg0: i32) -> (i32, i32) {
    %c0_i32 = arith.constant 0 : i32
    %c0_i32_0 = arith.constant 0 : i32
    return %arg0, %c0_i32 : i32, i32
  }
  func.func @transform_1(%arg0: i32) -> (i32, i32) {
    %c0_i32 = arith.constant 0 : i32
    %c0_i32_0 = arith.constant 0 : i32
    %c0_i32_1 = arith.constant 0 : i32
    return %c0_i32, %c0_i32_0 : i32, i32
  }
  func.func @transform_2(%arg0: i32) -> (i32, i32) {
    %c0_i32 = arith.constant 0 : i32
    %c0_i32_0 = arith.constant 0 : i32
    %c0_i32_1 = arith.constant 0 : i32
    return %c0_i32, %c0_i32_0 : i32, i32
  }
  func.func @transform_3(%arg0: i32) -> (i32, i32) {
    %c0_i32 = arith.constant 0 : i32
    %c0_i32_0 = arith.constant 0 : i32
    %c0_i32_1 = arith.constant 0 : i32
    return %c0_i32, %c0_i32_0 : i32, i32
  }
  func.func @transform_4(%arg0: i32) -> (i32, i32) {
    %c0_i32 = arith.constant 0 : i32
    %c0_i32_0 = arith.constant 0 : i32
    %c0_i32_1 = arith.constant 0 : i32
    return %c0_i32, %c0_i32_0 : i32, i32
  }
  func.func @transform_5(%arg0: i32) -> (i32, i32) {
    %c0_i32 = arith.constant 0 : i32
    %c0_i32_0 = arith.constant 0 : i32
    return %arg0, %c0_i32 : i32, i32
  }
}

</mosaic_0001>

<bundles_post_ra>
// kernel: tpu_custom_call.1
= control target key start
LH: loop header
LB: loop body
LE: loop exit
PB: predicated region body
PF: predicated region fallthrough
CT: control target
= control target key end

     0   :  { %10 = vsyncpa [#allocation3], 0  ;;  %s4471_s0 = inlined_call_operand.hbm [shape: bf16[8,1024], index: 0, kind: input, shape index: {}]   ;;  %s4472_s1 = inlined_call_operand.hbm [shape: bf16[1024,640], index: 1, kind: input, shape index: {}]   ;;  %s4473_s2 = inlined_call_operand.hbm [shape: f32[1,640], index: 2, kind: input, shape index: {}]   ;;  %s4474_s3 = inlined_call_operand.hbm [shape: bf16[640,128], index: 3, kind: input, shape index: {}]   ;;  %s4475_s4 = inlined_call_operand.hbm [shape: f32[1,128], index: 4, kind: input, shape index: {}]   ;;  %s4476_s5 = inlined_call_operand.hbm [shape: f32[8,128], index: 5, kind: output, shape index: {}]  }
   0x1   :  { %11 = vsyncpa [#allocation6], 0 }
   0x2   :  { %12 = vsyncpa [#allocation9], 0 }
   0x3   :  { %13 = vsyncpa [#allocation4], 0  ;;  %s4334_s18 = smov [#allocation5]  }
   0x4   :  { %s29_s19 = sshll.u32 %s4334_s18, 4  ;;  %s30_s19 = int_to_ptr.vmem [resolvable:$true] %s29_s19 }
   0x5   :  { %s4214_s20 = scalar_lea.vmem %s30_s19, 40960  ;;  %p4219_p1 = scmp.lt.s32.totalorder %s30_s19, %s30_s19 }
   0x6   :  { %p4215_p0 = scmp.ne.s32.totalorder %s30_s19, %s4214_s20  ;;  %p4220_p2 = scmp.lt.s32.totalorder %s4214_s20, %s4214_s20 }
   0x8   :  { %p4221_p3 = por %p4220_p2, %p4219_p1 }
   0xa   :  { %p4222_p4 = pnand %p4221_p3, %p4215_p0 }
   0xc   :  { %4225 = shalt.err (!%p4222_p4)
}
   0xd   :  { %s4335_s21 = smov 320   ;;  %s4336_s22 = smov 20  }
   0xe   :  { %35 = dma.hbm_to_vmem [thread:$0]  %s4472_s1, 40960, %s30_s19, [#allocation6], %s4335_s21, %s4335_s21, %s4336_s22  }
   0xf   :  { %s4337_s25 = smov [#allocation8]  }
  0x10   :  { %s51_s26 = sshll.u32 %s4337_s25, 4  ;;  %s52_s26 = int_to_ptr.vmem [resolvable:$true] %s51_s26 }
  0x11   :  { %s4234_s27 = scalar_lea.vmem %s52_s26, 5120  ;;  %p4239_p6 = scmp.lt.s32.totalorder %s52_s26, %s52_s26 }
  0x12   :  { %p4235_p5 = scmp.ne.s32.totalorder %s52_s26, %s4234_s27  ;;  %p4240_p7 = scmp.lt.s32.totalorder %s4234_s27, %s4234_s27 }
  0x14   :  { %p4241_p8 = por %p4240_p7, %p4239_p6 }
  0x16   :  { %p4242_p9 = pnand %p4241_p8, %p4235_p5 }
  0x18   :  { %4245 = shalt.err (!%p4242_p9)
}
  0x19   :  { %s4338_s28 = smov 64   ;;  %s4339_s29 = smov 4  }
  0x1a   :  { %57 = dma.hbm_to_vmem [thread:$0]  %s4474_s3, 5120, %s52_s26, [#allocation9], %s4338_s28, %s4338_s28, %s4339_s29  }
  0x1b   :  { %s4340_s7 = smov [#allocation2]   ;;  %s4341_s9 = smov [#allocation7]  }
  0x1c   :  { %s20_s8 = sshll.u32 %s4340_s7, 4  ;;  %s42_s1 = sshll.u32 %s4341_s9, 4  ;;  %s21_s8 = int_to_ptr.vmem [resolvable:$true] %s20_s8  ;;  %s43_s1 = int_to_ptr.vmem [resolvable:$true] %s42_s1 }
  0x1d   :  { %s4254_s10 = scalar_lea.vmem %s21_s8, 512  ;;  %p4259_p11 = scmp.lt.s32.totalorder %s21_s8, %s21_s8 }
  0x1e   :  { %p4255_p10 = scmp.ne.s32.totalorder %s21_s8, %s4254_s10  ;;  %p4260_p12 = scmp.lt.s32.totalorder %s4254_s10, %s4254_s10 }
  0x20   :  { %p4261_p13 = por %p4260_p12, %p4259_p11 }
  0x22   :  { %p4262_p0 = pnand %p4261_p13, %p4255_p10 }
  0x24   :  { %4265 = shalt.err (!%p4262_p0)
}
  0x25   :  { %23 = dma.hbm_to_vmem [thread:$0]  %s4471_s0, 512, %s21_s8, [#allocation3]  }
  0x26   :  { %s4274_s13 = scalar_lea.vmem %s43_s1, 80  ;;  %s4278_s3 = scalar_lea.vmem %s43_s1, 96 }
  0x27   :  { %p4275_p1 = scmp.ne.s32.totalorder %s43_s1, %s4274_s13  ;;  %p4279_p2 = scmp.lt.s32.totalorder %s43_s1, %s43_s1 }
  0x28   :  { %p4280_p3 = scmp.lt.s32.totalorder %s4278_s3, %s4274_s13 }
  0x2a   :  { %p4281_p4 = por %p4280_p3, %p4279_p2 }
  0x2c   :  { %p4282_p5 = pnand %p4281_p4, %p4275_p1 }
  0x2e   :  { %4285 = shalt.err (!%p4282_p5)
}
  0x2f   :  { %45 = dma.hbm_to_vmem [thread:$0]  %s4473_s2, 80, %s43_s1, [#allocation6]  }
  0x30   :  { %s4342_s16 = smov [#allocation10]  }
  0x31   :  { %s64_s17 = sshll.u32 %s4342_s16, 4  ;;  %s65_s17 = int_to_ptr.vmem [resolvable:$true] %s64_s17 }
  0x32   :  { %s4294_s18 = scalar_lea.vmem %s65_s17, 16  ;;  %s4298_s19 = scalar_lea.vmem %s65_s17, 32 }
  0x33   :  { %p4295_p6 = scmp.ne.s32.totalorder %s65_s17, %s4294_s18  ;;  %p4299_p7 = scmp.lt.s32.totalorder %s65_s17, %s65_s17 }
  0x34   :  { %p4300_p8 = scmp.lt.s32.totalorder %s4298_s19, %s4294_s18 }
  0x36   :  { %p4301_p9 = por %p4300_p8, %p4299_p7 }
  0x38   :  { %p4302_p10 = pnand %p4301_p9, %p4295_p6 }
  0x3a   :  { %4305 = shalt.err (!%p4302_p10)
}
  0x3b   :  { %67 = dma.hbm_to_vmem [thread:$0]  %s4475_s4, 16, %s65_s17, [#allocation9]  }
  0x3c   :  { %4326 = dma.done.wait [#allocation3], 512  }
  0x3d   :  { %4327 = vsyncadd [#allocation3], 4294966784 }
  0x3e   :  { %4328 = dma.done.wait [#allocation6], 41040  }
  0x3f   :  { %4329 = vsyncadd [#allocation6], 4294926256 }
  0x40   :  { %4330 = dma.done.wait [#allocation9], 5136  }
  0x41   :  { %4331 = vsyncadd [#allocation9], 4294962160  ;;  %v3706_v0 = vld [vmem:[#allocation5 + $0x11c] ss:$20 sps:$4 sm:$0xff]   ;;  %v3710_v2 = vld [vmem:[#allocation5 + $0x118] ss:$20 sps:$4 sm:$0xff]  }
  0x42   :  { %v3708_v1 = vld [vmem:[#allocation5 + $0x39c] ss:$20 sps:$4 sm:$0xff]   ;;  %2191 = vmatprep.subr.bf16.mxu0 %v3706_v0  ;;  %v3711_v3 = vld [vmem:[#allocation5 + $0x398] ss:$20 sps:$4 sm:$0xff]   ;;  %v3712_v4 = vld [vmem:[#allocation5 + $0xf4] ss:$20 sps:$4 sm:$0xff]  }
  0x43   :  { %2232 = vmatprep.subr.bf16.mxu1 %v3708_v1  ;;  %2192 = vmatpush1.bf16.msra.mxu0 %v3710_v2  ;;  %v3714_v5 = vld [vmem:[#allocation5 + $0x374] ss:$20 sps:$4 sm:$0xff]   ;;  %v3716_v6 = vld [vmem:[#allocation5 + $0xf0] ss:$20 sps:$4 sm:$0xff]   ;;  %v3718_v8 = vld [vmem:[#allocation5 + $0xcc] ss:$20 sps:$4 sm:$0xff]  }
  0x44   :  { %2233 = vmatpush1.bf16.msra.mxu1 %v3711_v3  ;;  %2193 = vmatprep.subr.bf16.mxu0 %v3712_v4  ;;  %v3717_v7 = vld [vmem:[#allocation5 + $0x370] ss:$20 sps:$4 sm:$0xff]   ;;  %v3720_v9 = vld [vmem:[#allocation5 + $0x34c] ss:$20 sps:$4 sm:$0xff]   ;;  %v3722_v10 = vld [vmem:[#allocation5 + $0xc8] ss:$20 sps:$4 sm:$0xff]  }
  0x45   :  { %2234 = vmatprep.subr.bf16.mxu1 %v3714_v5  ;;  %v3723_v11 = vld [vmem:[#allocation5 + $0x348] ss:$20 sps:$4 sm:$0xff]   ;;  %v3724_v12 = vld [vmem:[#allocation5 + $0xa4] ss:$20 sps:$4 sm:$0xff]   ;;  %v3728_v14 = vld [vmem:[#allocation5 + $0xa0] ss:$20 sps:$4 sm:$0xff]  }
  0x46   :  { %v3726_v13 = vld [vmem:[#allocation5 + $0x324] ss:$20 sps:$4 sm:$0xff]   ;;  %v3729_v15 = vld [vmem:[#allocation5 + $0x320] ss:$20 sps:$4 sm:$0xff]   ;;  %v3730_v16 = vld [vmem:[#allocation5 + $0x7c] ss:$20 sps:$4 sm:$0xff]  }
  0x47   :  { %2194 = vmatpush1.bf16.msra.mxu0 %v3716_v6  ;;  %v3732_v17 = vld [vmem:[#allocation5 + $0x2fc] ss:$20 sps:$4 sm:$0xff]   ;;  %v3734_v18 = vld [vmem:[#allocation5 + $0x78] ss:$20 sps:$4 sm:$0xff]   ;;  %v3736_v20 = vld [vmem:[#allocation5 + $0x54] ss:$20 sps:$4 sm:$0xff]  }
  0x48   :  { %2235 = vmatpush1.bf16.msra.mxu1 %v3717_v7  ;;  %2195 = vmatprep.subr.bf16.mxu0 %v3718_v8  ;;  %v3735_v19 = vld [vmem:[#allocation5 + $0x2f8] ss:$20 sps:$4 sm:$0xff]   ;;  %v3738_v21 = vld [vmem:[#allocation5 + $0x2d4] ss:$20 sps:$4 sm:$0xff]   ;;  %v3740_v22 = vld [vmem:[#allocation5 + $0x50] ss:$20 sps:$4 sm:$0xff]  }
  0x49   :  { %2236 = vmatprep.subr.bf16.mxu1 %v3720_v9  ;;  %v3741_v23 = vld [vmem:[#allocation5 + $0x2d0] ss:$20 sps:$4 sm:$0xff]   ;;  %v3742_v24 = vld [vmem:[#allocation5 + $0x2c] ss:$20 sps:$4 sm:$0xff]   ;;  %v3746_v26 = vld [vmem:[#allocation5 + $0x28] ss:$20 sps:$4 sm:$0xff]  }
  0x4a   :  { %v3744_v25 = vld [vmem:[#allocation5 + $0x2ac] ss:$20 sps:$4 sm:$0xff]   ;;  %v3747_v27 = vld [vmem:[#allocation5 + $0x2a8] ss:$20 sps:$4 sm:$0xff]   ;;  %v3748_v28 = vld [vmem:[#allocation5 + $0x4] ss:$20 sps:$4 sm:$0xff]  }
  0x4b   :  { %2196 = vmatpush1.bf16.msra.mxu0 %v3722_v10  ;;  %v3750_v29 = vld [vmem:[#allocation5 + $0x284] ss:$20 sps:$4 sm:$0xff]   ;;  %v3752_v30 = vld [vmem:[#allocation5] ss:$20 sps:$4 sm:$0xff]   ;;  %v3754_v32 = vld [vmem:[#allocation5 + $0x25c] ss:$20 sps:$4 sm:$0xff]  }
  0x4c   :  { %2237 = vmatpush1.bf16.msra.mxu1 %v3723_v11  ;;  %2197 = vmatprep.subr.bf16.mxu0 %v3724_v12  ;;  %v3753_v31 = vld [vmem:[#allocation5 + $0x280] ss:$20 sps:$4 sm:$0xff]   ;;  %v3756_v33 = vld [vmem:[#allocation5 + $0x4dc] ss:$20 sps:$4 sm:$0xff]   ;;  %v3758_v34 = vld [vmem:[#allocation5 + $0x258] ss:$20 sps:$4 sm:$0xff]  }
  0x4d   :  { %2238 = vmatprep.subr.bf16.mxu1 %v3726_v13  ;;  %v3759_v35 = vld [vmem:[#allocation5 + $0x4d8] ss:$20 sps:$4 sm:$0xff]   ;;  %v3760_v36 = vld [vmem:[#allocation5 + $0x234] ss:$20 sps:$4 sm:$0xff]   ;;  %v3764_v38 = vld [vmem:[#allocation5 + $0x230] ss:$20 sps:$4 sm:$0xff]  }
  0x4e   :  { %v3762_v37 = vld [vmem:[#allocation5 + $0x4b4] ss:$20 sps:$4 sm:$0xff]   ;;  %v3765_v39 = vld [vmem:[#allocation5 + $0x4b0] ss:$20 sps:$4 sm:$0xff]   ;;  %v3766_v40 = vld [vmem:[#allocation5 + $0x20c] ss:$20 sps:$4 sm:$0xff]  }
  0x4f   :  { %2198 = vmatpush1.bf16.msra.mxu0 %v3728_v14  ;;  %v3768_v41 = vld [vmem:[#allocation5 + $0x48c] ss:$20 sps:$4 sm:$0xff]   ;;  %v3770_v42 = vld [vmem:[#allocation5 + $0x208] ss:$20 sps:$4 sm:$0xff]   ;;  %v3772_v44 = vld [vmem:[#allocation5 + $0x1e4] ss:$20 sps:$4 sm:$0xff]  }
  0x50   :  { %2239 = vmatpush1.bf16.msra.mxu1 %v3729_v15  ;;  %2199 = vmatprep.subr.bf16.mxu0 %v3730_v16  ;;  %v3771_v43 = vld [vmem:[#allocation5 + $0x488] ss:$20 sps:$4 sm:$0xff]   ;;  %v3774_v45 = vld [vmem:[#allocation5 + $0x464] ss:$20 sps:$4 sm:$0xff]   ;;  %v3776_v49 = vld [vmem:[#allocation5 + $0x1e0] ss:$20 sps:$4 sm:$0xff]  }
  0x51   :  { %2240 = vmatprep.subr.bf16.mxu1 %v3732_v17  ;;  %v84_v46 = vld [vmem:[#allocation2] sm:$0xff]  ;;  %v85_v48 = vld [vmem:[#allocation2 + $0x8] sm:$0xff]  ;;  %v3778_v52 = vld [vmem:[#allocation5 + $0x1bc] ss:$20 sps:$4 sm:$0xff]   ;;  %vm4344_vm0 = vmmov 0   ;;  %s4345_s2 = smov [#allocation11]  }
  0x52   :  { %v4391_v47 = vcombine.high %v84_v46, %v84_v46  ;;  %v3777_v50 = vld [vmem:[#allocation5 + $0x460] ss:$20 sps:$4 sm:$0xff]   ;;  %v4393_v51 = vcombine.high %v85_v48, %v85_v48  ;;  %v3780_v53 = vld [vmem:[#allocation5 + $0x43c] ss:$20 sps:$4 sm:$0xff]   ;;  %v3782_v54 = vld [vmem:[#allocation5 + $0x1b8] ss:$20 sps:$4 sm:$0xff]   ;;  %v4397_v6 = vcombine.low %v84_v46, %v84_v46  ;;  %v4399_v7 = vcombine.low %v85_v48, %v85_v48 }
  0x53   :  { %2200 = vmatpush1.bf16.msra.mxu0 %v3734_v18  ;;  %v3783_v55 = vld [vmem:[#allocation5 + $0x438] ss:$20 sps:$4 sm:$0xff]   ;;  %v3784_v56 = vld [vmem:[#allocation5 + $0x194] ss:$20 sps:$4 sm:$0xff]   ;;  %v3788_v58 = vld [vmem:[#allocation5 + $0x190] ss:$20 sps:$4 sm:$0xff]  }
  0x54   :  { %2241 = vmatpush1.bf16.msra.mxu1 %v3735_v19  ;;  %2201 = vmatprep.subr.bf16.mxu0 %v3736_v20  ;;  %v3786_v57 = vld [vmem:[#allocation5 + $0x414] ss:$20 sps:$4 sm:$0xff]   ;;  %v3789_v59 = vld [vmem:[#allocation5 + $0x410] ss:$20 sps:$4 sm:$0xff]   ;;  %v3790_v60 = vld [vmem:[#allocation5 + $0x16c] ss:$20 sps:$4 sm:$0xff]  }
  0x55   :  { %2242 = vmatprep.subr.bf16.mxu1 %v3738_v21  ;;  %2223 = vmatprep.mubr.bf16.mxu0 %v4391_v47  ;;  %v3792_v61 = vld [vmem:[#allocation5 + $0x3ec] ss:$20 sps:$4 sm:$0xff]   ;;  %v3794_v62 = vld [vmem:[#allocation5 + $0x168] ss:$20 sps:$4 sm:$0xff]   ;;  %v3796_v0 = vld [vmem:[#allocation5 + $0x144] ss:$20 sps:$4 sm:$0xff]  }
  0x56   :  { %2264 = vmatprep.mubr.bf16.mxu1 %v4393_v51  ;;  %v3795_v63 = vld [vmem:[#allocation5 + $0x3e8] ss:$20 sps:$4 sm:$0xff]   ;;  %v3798_v1 = vld [vmem:[#allocation5 + $0x3c4] ss:$20 sps:$4 sm:$0xff]   ;;  %v3800_v2 = vld [vmem:[#allocation5 + $0x140] ss:$20 sps:$4 sm:$0xff]  }
  0x57   :  { %2202 = vmatpush1.bf16.msra.mxu0 %v3740_v22  ;;  %v3801_v3 = vld [vmem:[#allocation5 + $0x3c0] ss:$20 sps:$4 sm:$0xff]   ;;  %v3808_v4 = vld [vmem:[#allocation5 + $0x61c] ss:$20 sps:$4 sm:$0xff]   ;;  %v3806_v8 = vld [vmem:[#allocation5 + $0x618] ss:$20 sps:$4 sm:$0xff]  }
  0x58   :  { %2243 = vmatpush1.bf16.msra.mxu1 %v3741_v23  ;;  %2203 = vmatprep.subr.bf16.mxu0 %v3742_v24  ;;  %v3811_v5 = vld [vmem:[#allocation5 + $0x89c] ss:$20 sps:$4 sm:$0xff]   ;;  %v3809_v9 = vld [vmem:[#allocation5 + $0x898] ss:$20 sps:$4 sm:$0xff]   ;;  %v3814_v10 = vld [vmem:[#allocation5 + $0x5f4] ss:$20 sps:$4 sm:$0xff]  }
  0x59   :  { %2244 = vmatprep.subr.bf16.mxu1 %v3744_v25  ;;  %v3817_v11 = vld [vmem:[#allocation5 + $0x874] ss:$20 sps:$4 sm:$0xff]   ;;  %v3812_v12 = vld [vmem:[#allocation5 + $0x5f0] ss:$20 sps:$4 sm:$0xff]   ;;  %v3820_v14 = vld [vmem:[#allocation5 + $0x5cc] ss:$20 sps:$4 sm:$0xff]  }
  0x5a   :  { %v3815_v13 = vld [vmem:[#allocation5 + $0x870] ss:$20 sps:$4 sm:$0xff]   ;;  %v3823_v15 = vld [vmem:[#allocation5 + $0x84c] ss:$20 sps:$4 sm:$0xff]   ;;  %v3818_v16 = vld [vmem:[#allocation5 + $0x5c8] ss:$20 sps:$4 sm:$0xff]  }
  0x5b   :  { %2204 = vmatpush1.bf16.msra.mxu0 %v3746_v26  ;;  %v3821_v17 = vld [vmem:[#allocation5 + $0x848] ss:$20 sps:$4 sm:$0xff]   ;;  %v3826_v18 = vld [vmem:[#allocation5 + $0x5a4] ss:$20 sps:$4 sm:$0xff]   ;;  %v3824_v20 = vld [vmem:[#allocation5 + $0x5a0] ss:$20 sps:$4 sm:$0xff]  }
  0x5c   :  { %2245 = vmatpush1.bf16.msra.mxu1 %v3747_v27  ;;  %2205 = vmatprep.subr.bf16.mxu0 %v3748_v28  ;;  %v3829_v19 = vld [vmem:[#allocation5 + $0x824] ss:$20 sps:$4 sm:$0xff]   ;;  %v3827_v21 = vld [vmem:[#allocation5 + $0x820] ss:$20 sps:$4 sm:$0xff]   ;;  %v3832_v22 = vld [vmem:[#allocation5 + $0x57c] ss:$20 sps:$4 sm:$0xff]  }
  0x5d   :  { %2246 = vmatprep.subr.bf16.mxu1 %v3750_v29  ;;  %v3835_v23 = vld [vmem:[#allocation5 + $0x7fc] ss:$20 sps:$4 sm:$0xff]   ;;  %v3830_v24 = vld [vmem:[#allocation5 + $0x578] ss:$20 sps:$4 sm:$0xff]   ;;  %v3838_v26 = vld [vmem:[#allocation5 + $0x554] ss:$20 sps:$4 sm:$0xff]  }
  0x5e   :  { %v3833_v25 = vld [vmem:[#allocation5 + $0x7f8] ss:$20 sps:$4 sm:$0xff]   ;;  %v3841_v27 = vld [vmem:[#allocation5 + $0x7d4] ss:$20 sps:$4 sm:$0xff]   ;;  %v3836_v28 = vld [vmem:[#allocation5 + $0x550] ss:$20 sps:$4 sm:$0xff]  }
  0x5f   :  { %2206 = vmatpush1.bf16.msra.mxu0 %v3752_v30  ;;  %v3839_v29 = vld [vmem:[#allocation5 + $0x7d0] ss:$20 sps:$4 sm:$0xff]   ;;  %v3844_v30 = vld [vmem:[#allocation5 + $0x52c] ss:$20 sps:$4 sm:$0xff]   ;;  %v3862_v46 = vld [vmem:[#allocation5 + $0x734] ss:$20 sps:$4 sm:$0xff]  }
  0x60   :  { %2247 = vmatpush1.bf16.msra.mxu1 %v3753_v31  ;;  %2207 = vmatprep.subr.bf16.mxu0 %v3754_v32  ;;  %v3847_v31 = vld [vmem:[#allocation5 + $0x7ac] ss:$20 sps:$4 sm:$0xff]   ;;  %v4403_v32 = vld [vmem:[#allocation2 + $0x10] sm:$0xff]  ;;  %s3153_s4 = sshll.u32 %s4345_s2, 4  ;;  %s3154_s4 = int_to_ptr.vmem [resolvable:$true] %s3153_s4 }
  0x61   :  { %2248 = vmatprep.subr.bf16.mxu1 %v3756_v33  ;;  %v4405_v33 = vld [vmem:[#allocation2 + $0x18] sm:$0xff]  ;;  %v3865_v48 = vld [vmem:[#allocation5 + $0x9b4] ss:$20 sps:$4 sm:$0xff]   ;;  %s4306_s21 = scalar_lea.vmem %s3154_s4, 128  ;;  %p4311_p12 = scmp.lt.s32.totalorder %s3154_s4, %s3154_s4 }
  0x62   :  { %p4307_p11 = scmp.ne.s32.totalorder %s3154_s4, %s4306_s21  ;;  %p4312_p13 = scmp.lt.s32.totalorder %s4306_s21, %s4306_s21 }
  0x63   :  { %2208 = vmatpush2.bf16.msra.mxu0 %v3758_v34  ;;  %v3842_v34 = vld [vmem:[#allocation5 + $0x528] ss:$20 sps:$4 sm:$0xff]  }
  0x64   :  { %2249 = vmatpush2.bf16.msra.mxu1 %v3759_v35  ;;  %2209 = vmatprep.subr.bf16.mxu0 %v3760_v36  ;;  %v3845_v35 = vld [vmem:[#allocation5 + $0x7a8] ss:$20 sps:$4 sm:$0xff]   ;;  %v4409_v36 = vcombine.high %v4403_v32, %v4403_v32  ;;  %p4313_p0 = por %p4312_p13, %p4311_p12 }
  0x65   :  { %2250 = vmatprep.subr.bf16.mxu1 %v3762_v37  ;;  %v4413_v37 = vcombine.high %v4405_v33, %v4405_v33 }
  0x66   :  { %p4314_p1 = pnand %p4313_p0, %p4307_p11 }
  0x67   :  { %2210 = vmatpush2.bf16.msra.mxu0 %v3764_v38  ;;  %v3850_v38 = vld [vmem:[#allocation5 + $0x504] ss:$20 sps:$4 sm:$0xff]  }
  0x68   :  { %2251 = vmatpush2.bf16.msra.mxu1 %v3765_v39  ;;  %2211 = vmatprep.subr.bf16.mxu0 %v3766_v40  ;;  %v3853_v39 = vld [vmem:[#allocation5 + $0x784] ss:$20 sps:$4 sm:$0xff]   ;;  %v3848_v40 = vld [vmem:[#allocation5 + $0x500] ss:$20 sps:$4 sm:$0xff]  }
  0x69   :  { %2252 = vmatprep.subr.bf16.mxu1 %v3768_v41  ;;  %v3851_v41 = vld [vmem:[#allocation5 + $0x780] ss:$20 sps:$4 sm:$0xff]  }
  0x6b   :  { %2212 = vmatpush2.bf16.msra.mxu0 %v3770_v42  ;;  %v3856_v42 = vld [vmem:[#allocation5 + $0x75c] ss:$20 sps:$4 sm:$0xff]  }
  0x6c   :  { %2253 = vmatpush2.bf16.msra.mxu1 %v3771_v43  ;;  %2213 = vmatprep.subr.bf16.mxu0 %v3772_v44  ;;  %v3859_v43 = vld [vmem:[#allocation5 + $0x9dc] ss:$20 sps:$4 sm:$0xff]   ;;  %v3854_v44 = vld [vmem:[#allocation5 + $0x758] ss:$20 sps:$4 sm:$0xff]  }
  0x6d   :  { %2254 = vmatprep.subr.bf16.mxu1 %v3774_v45  ;;  %v3857_v45 = vld [vmem:[#allocation5 + $0x9d8] ss:$20 sps:$4 sm:$0xff]  }
  0x6f   :  { %2214 = vmatpush2.bf16.msra.mxu0 %v3776_v49  ;;  %v3860_v49 = vld [vmem:[#allocation5 + $0x730] ss:$20 sps:$4 sm:$0xff]  }
  0x70   :  { %2255 = vmatpush2.bf16.msra.mxu1 %v3777_v50  ;;  %2215 = vmatprep.subr.bf16.mxu0 %v3778_v52  ;;  %v3863_v50 = vld [vmem:[#allocation5 + $0x9b0] ss:$20 sps:$4 sm:$0xff]   ;;  %v3868_v52 = vld [vmem:[#allocation5 + $0x70c] ss:$20 sps:$4 sm:$0xff]  }
  0x71   :  { %2256 = vmatprep.subr.bf16.mxu1 %v3780_v53  ;;  %v3871_v53 = vld [vmem:[#allocation5 + $0x98c] ss:$20 sps:$4 sm:$0xff]  }
  0x73   :  { %2216 = vmatpush2.bf16.msra.mxu0 %v3782_v54  ;;  %v3866_v54 = vld [vmem:[#allocation5 + $0x708] ss:$20 sps:$4 sm:$0xff]  }
  0x74   :  { %2257 = vmatpush2.bf16.msra.mxu1 %v3783_v55  ;;  %2217 = vmatprep.subr.bf16.mxu0 %v3784_v56  ;;  %v3869_v55 = vld [vmem:[#allocation5 + $0x988] ss:$20 sps:$4 sm:$0xff]   ;;  %v3874_v56 = vld [vmem:[#allocation5 + $0x6e4] ss:$20 sps:$4 sm:$0xff]  }
  0x75   :  { %2258 = vmatprep.subr.bf16.mxu1 %v3786_v57  ;;  %v3877_v57 = vld [vmem:[#allocation5 + $0x964] ss:$20 sps:$4 sm:$0xff]  }
  0x77   :  { %2218 = vmatpush2.bf16.msra.mxu0 %v3788_v58  ;;  %v3872_v58 = vld [vmem:[#allocation5 + $0x6e0] ss:$20 sps:$4 sm:$0xff]  }
  0x78   :  { %2259 = vmatpush2.bf16.msra.mxu1 %v3789_v59  ;;  %2219 = vmatprep.subr.bf16.mxu0 %v3790_v60  ;;  %v3875_v59 = vld [vmem:[#allocation5 + $0x960] ss:$20 sps:$4 sm:$0xff]   ;;  %v3880_v60 = vld [vmem:[#allocation5 + $0x6bc] ss:$20 sps:$4 sm:$0xff]  }
  0x79   :  { %2260 = vmatprep.subr.bf16.mxu1 %v3792_v61  ;;  %v3883_v61 = vld [vmem:[#allocation5 + $0x93c] ss:$20 sps:$4 sm:$0xff]  }
  0x7b   :  { %2220 = vmatpush2.bf16.msra.mxu0 %v3794_v62  ;;  %v3878_v62 = vld [vmem:[#allocation5 + $0x6b8] ss:$20 sps:$4 sm:$0xff]  }
  0x7c   :  { %2261 = vmatpush2.bf16.msra.mxu1 %v3795_v63  ;;  %2221 = vmatprep.subr.bf16.mxu0 %v3796_v0  ;;  %v3881_v63 = vld [vmem:[#allocation5 + $0x938] ss:$20 sps:$4 sm:$0xff]   ;;  %v3886_v0 = vld [vmem:[#allocation5 + $0x694] ss:$20 sps:$4 sm:$0xff]  }
  0x7d   :  { %2262 = vmatprep.subr.bf16.mxu1 %v3798_v1  ;;  %v3889_v1 = vld [vmem:[#allocation5 + $0x914] ss:$20 sps:$4 sm:$0xff]  }
  0x7f   :  { %2222 = vmatpush2.bf16.msra.mxu0 %v3800_v2  ;;  %v3884_v2 = vld [vmem:[#allocation5 + $0x690] ss:$20 sps:$4 sm:$0xff]  }
  0x80   :  { %2263 = vmatpush2.bf16.msra.mxu1 %v3801_v3  ;;  %2273 = vmatprep.subr.bf16.mxu0 %v3808_v4  ;;  %v3887_v3 = vld [vmem:[#allocation5 + $0x910] ss:$20 sps:$4 sm:$0xff]   ;;  %v3892_v4 = vld [vmem:[#allocation5 + $0x66c] ss:$20 sps:$4 sm:$0xff]  }
  0x81   :  { %2314 = vmatprep.subr.bf16.mxu1 %v3811_v5  ;;  %v3895_v5 = vld [vmem:[#allocation5 + $0x8ec] ss:$20 sps:$4 sm:$0xff]  }
  0x82   :  { %2224 = vmatmul.mubr.bf16.vlgmr.msra.gmra.mxu0 %v4397_v6 }
  0x83   :  { %2265 = vmatmul.mubr.bf16.vlgmr.msra.gmra.mxu1 %v4399_v7  ;;  %2274 = vmatpush1.bf16.msra.mxu0 %v3806_v8  ;;  %v3890_v8 = vld [vmem:[#allocation5 + $0x668] ss:$20 sps:$4 sm:$0xff]  }
  0x84   :  { %2315 = vmatpush1.bf16.msra.mxu1 %v3809_v9  ;;  %2275 = vmatprep.subr.bf16.mxu0 %v3814_v10  ;;  %v3893_v9 = vld [vmem:[#allocation5 + $0x8e8] ss:$20 sps:$4 sm:$0xff]   ;;  %v3898_v10 = vld [vmem:[#allocation5 + $0x644] ss:$20 sps:$4 sm:$0xff]  }
  0x85   :  { %2316 = vmatprep.subr.bf16.mxu1 %v3817_v11  ;;  %2305 = vmatprep.mubr.bf16.mxu0 %v4409_v36  ;;  %v3901_v11 = vld [vmem:[#allocation5 + $0x8c4] ss:$20 sps:$4 sm:$0xff]  }
  0x86   :  { %2346 = vmatprep.mubr.bf16.mxu1 %v4413_v37 }
  0x87   :  { %2276 = vmatpush1.bf16.msra.mxu0 %v3812_v12  ;;  %v3896_v12 = vld [vmem:[#allocation5 + $0x640] ss:$20 sps:$4 sm:$0xff]  }
  0x88   :  { %2317 = vmatpush1.bf16.msra.mxu1 %v3815_v13  ;;  %2277 = vmatprep.subr.bf16.mxu0 %v3820_v14  ;;  %v3899_v13 = vld [vmem:[#allocation5 + $0x8c0] ss:$20 sps:$4 sm:$0xff]   ;;  %v3908_v14 = vld [vmem:[#allocation5 + $0x124] ss:$20 sps:$4 sm:$0xff]  }
  0x89   :  { %2318 = vmatprep.subr.bf16.mxu1 %v3823_v15  ;;  %v3911_v15 = vld [vmem:[#allocation5 + $0x3a4] ss:$20 sps:$4 sm:$0xff]  }
  0x8b   :  { %2278 = vmatpush1.bf16.msra.mxu0 %v3818_v16  ;;  %v4419_v16 = vcombine.low %v4403_v32, %v4403_v32  ;;  %v3932_v32 = vld [vmem:[#allocation5 + $0x84] ss:$20 sps:$4 sm:$0xff]  }
  0x8c   :  { %2319 = vmatpush1.bf16.msra.mxu1 %v3821_v17  ;;  %2279 = vmatprep.subr.bf16.mxu0 %v3826_v18  ;;  %v4423_v17 = vcombine.low %v4405_v33, %v4405_v33  ;;  %v3906_v18 = vld [vmem:[#allocation5 + $0x120] ss:$20 sps:$4 sm:$0xff]   ;;  %v3935_v33 = vld [vmem:[#allocation5 + $0x304] ss:$20 sps:$4 sm:$0xff]  }
  0x8d   :  { %2320 = vmatprep.subr.bf16.mxu1 %v3829_v19  ;;  %v3909_v19 = vld [vmem:[#allocation5 + $0x3a0] ss:$20 sps:$4 sm:$0xff]  }
  0x8f   :  { %2280 = vmatpush1.bf16.msra.mxu0 %v3824_v20  ;;  %v3914_v20 = vld [vmem:[#allocation5 + $0xfc] ss:$20 sps:$4 sm:$0xff]  }
  0x90   :  { %2321 = vmatpush1.bf16.msra.mxu1 %v3827_v21  ;;  %2281 = vmatprep.subr.bf16.mxu0 %v3832_v22  ;;  %v3917_v21 = vld [vmem:[#allocation5 + $0x37c] ss:$20 sps:$4 sm:$0xff]   ;;  %v3912_v22 = vld [vmem:[#allocation5 + $0xf8] ss:$20 sps:$4 sm:$0xff]  }
  0x91   :  { %2322 = vmatprep.subr.bf16.mxu1 %v3835_v23  ;;  %v3915_v23 = vld [vmem:[#allocation5 + $0x378] ss:$20 sps:$4 sm:$0xff]  }
  0x93   :  { %2282 = vmatpush1.bf16.msra.mxu0 %v3830_v24  ;;  %v3920_v24 = vld [vmem:[#allocation5 + $0xd4] ss:$20 sps:$4 sm:$0xff]  }
  0x94   :  { %2323 = vmatpush1.bf16.msra.mxu1 %v3833_v25  ;;  %2283 = vmatprep.subr.bf16.mxu0 %v3838_v26  ;;  %v3923_v25 = vld [vmem:[#allocation5 + $0x354] ss:$20 sps:$4 sm:$0xff]   ;;  %v3918_v26 = vld [vmem:[#allocation5 + $0xd0] ss:$20 sps:$4 sm:$0xff]  }
  0x95   :  { %2324 = vmatprep.subr.bf16.mxu1 %v3841_v27  ;;  %v3921_v27 = vld [vmem:[#allocation5 + $0x350] ss:$20 sps:$4 sm:$0xff]  }
  0x97   :  { %2284 = vmatpush1.bf16.msra.mxu0 %v3836_v28  ;;  %v3926_v28 = vld [vmem:[#allocation5 + $0xac] ss:$20 sps:$4 sm:$0xff]  }
  0x98   :  { %2325 = vmatpush1.bf16.msra.mxu1 %v3839_v29  ;;  %2285 = vmatprep.subr.bf16.mxu0 %v3844_v30  ;;  %v3929_v29 = vld [vmem:[#allocation5 + $0x32c] ss:$20 sps:$4 sm:$0xff]   ;;  %v3924_v30 = vld [vmem:[#allocation5 + $0xa8] ss:$20 sps:$4 sm:$0xff]  }
  0x99   :  { %2326 = vmatprep.subr.bf16.mxu1 %v3847_v31  ;;  %v3927_v31 = vld [vmem:[#allocation5 + $0x328] ss:$20 sps:$4 sm:$0xff]  }
  0x9b   :  { %2286 = vmatpush1.bf16.msra.mxu0 %v3842_v34  ;;  %v3930_v34 = vld [vmem:[#allocation5 + $0x80] ss:$20 sps:$4 sm:$0xff]  }
  0x9c   :  { %2327 = vmatpush1.bf16.msra.mxu1 %v3845_v35  ;;  %2287 = vmatprep.subr.bf16.mxu0 %v3850_v38  ;;  %v3933_v35 = vld [vmem:[#allocation5 + $0x300] ss:$20 sps:$4 sm:$0xff]   ;;  %v3938_v38 = vld [vmem:[#allocation5 + $0x5c] ss:$20 sps:$4 sm:$0xff]  }
  0x9d   :  { %2328 = vmatprep.subr.bf16.mxu1 %v3853_v39  ;;  %v3941_v39 = vld [vmem:[#allocation5 + $0x2dc] ss:$20 sps:$4 sm:$0xff]  }
  0x9f   :  { %2288 = vmatpush1.bf16.msra.mxu0 %v3848_v40  ;;  %v3936_v40 = vld [vmem:[#allocation5 + $0x58] ss:$20 sps:$4 sm:$0xff]  }
  0xa0   :  { %2329 = vmatpush1.bf16.msra.mxu1 %v3851_v41  ;;  %2289 = vmatprep.subr.bf16.mxu0 %v3856_v42  ;;  %v3939_v41 = vld [vmem:[#allocation5 + $0x2d8] ss:$20 sps:$4 sm:$0xff]   ;;  %v3944_v42 = vld [vmem:[#allocation5 + $0x34] ss:$20 sps:$4 sm:$0xff]  }
  0xa1   :  { %2330 = vmatprep.subr.bf16.mxu1 %v3859_v43  ;;  %v3947_v43 = vld [vmem:[#allocation5 + $0x2b4] ss:$20 sps:$4 sm:$0xff]  }
  0xa3   :  { %2290 = vmatpush2.bf16.msra.mxu0 %v3854_v44  ;;  %v3942_v44 = vld [vmem:[#allocation5 + $0x30] ss:$20 sps:$4 sm:$0xff]  }
  0xa4   :  { %2331 = vmatpush2.bf16.msra.mxu1 %v3857_v45  ;;  %2291 = vmatprep.subr.bf16.mxu0 %v3862_v46  ;;  %v3945_v45 = vld [vmem:[#allocation5 + $0x2b0] ss:$20 sps:$4 sm:$0xff]   ;;  %v3950_v46 = vld [vmem:[#allocation5 + $0xc] ss:$20 sps:$4 sm:$0xff]  }
  0xa5   :  { %2332 = vmatprep.subr.bf16.mxu1 %v3865_v48  ;;  %v3953_v48 = vld [vmem:[#allocation5 + $0x28c] ss:$20 sps:$4 sm:$0xff]  }
  0xa7   :  { %2292 = vmatpush2.bf16.msra.mxu0 %v3860_v49  ;;  %v3948_v49 = vld [vmem:[#allocation5 + $0x8] ss:$20 sps:$4 sm:$0xff]  }
  0xa8   :  { %2333 = vmatpush2.bf16.msra.mxu1 %v3863_v50  ;;  %2293 = vmatprep.subr.bf16.mxu0 %v3868_v52  ;;  %v3951_v50 = vld [vmem:[#allocation5 + $0x288] ss:$20 sps:$4 sm:$0xff]   ;;  %v3956_v52 = vld [vmem:[#allocation5 + $0x264] ss:$20 sps:$4 sm:$0xff]  }
  0xa9   :  { %2334 = vmatprep.subr.bf16.mxu1 %v3871_v53  ;;  %v3959_v53 = vld [vmem:[#allocation5 + $0x4e4] ss:$20 sps:$4 sm:$0xff]  }
  0xab   :  { %2294 = vmatpush2.bf16.msra.mxu0 %v3866_v54  ;;  %v3954_v54 = vld [vmem:[#allocation5 + $0x260] ss:$20 sps:$4 sm:$0xff]  }
  0xac   :  { %2335 = vmatpush2.bf16.msra.mxu1 %v3869_v55  ;;  %2295 = vmatprep.subr.bf16.mxu0 %v3874_v56  ;;  %v3957_v55 = vld [vmem:[#allocation5 + $0x4e0] ss:$20 sps:$4 sm:$0xff]   ;;  %v3962_v56 = vld [vmem:[#allocation5 + $0x23c] ss:$20 sps:$4 sm:$0xff]  }
  0xad   :  { %2336 = vmatprep.subr.bf16.mxu1 %v3877_v57  ;;  %v3965_v57 = vld [vmem:[#allocation5 + $0x4bc] ss:$20 sps:$4 sm:$0xff]  }
  0xaf   :  { %2296 = vmatpush2.bf16.msra.mxu0 %v3872_v58  ;;  %v3960_v58 = vld [vmem:[#allocation5 + $0x238] ss:$20 sps:$4 sm:$0xff]  }
  0xb0   :  { %2337 = vmatpush2.bf16.msra.mxu1 %v3875_v59  ;;  %2297 = vmatprep.subr.bf16.mxu0 %v3880_v60  ;;  %v3963_v59 = vld [vmem:[#allocation5 + $0x4b8] ss:$20 sps:$4 sm:$0xff]   ;;  %v3968_v60 = vld [vmem:[#allocation5 + $0x214] ss:$20 sps:$4 sm:$0xff]  }
  0xb1   :  { %2338 = vmatprep.subr.bf16.mxu1 %v3883_v61  ;;  %v3971_v61 = vld [vmem:[#allocation5 + $0x494] ss:$20 sps:$4 sm:$0xff]  }
  0xb3   :  { %2298 = vmatpush2.bf16.msra.mxu0 %v3878_v62  ;;  %v3966_v62 = vld [vmem:[#allocation5 + $0x210] ss:$20 sps:$4 sm:$0xff]  }
  0xb4   :  { %2339 = vmatpush2.bf16.msra.mxu1 %v3881_v63  ;;  %2299 = vmatprep.subr.bf16.mxu0 %v3886_v0  ;;  %v3969_v63 = vld [vmem:[#allocation5 + $0x490] ss:$20 sps:$4 sm:$0xff]   ;;  %v3974_v0 = vld [vmem:[#allocation5 + $0x1ec] ss:$20 sps:$4 sm:$0xff]  }
  0xb5   :  { %2340 = vmatprep.subr.bf16.mxu1 %v3889_v1  ;;  %v3977_v1 = vld [vmem:[#allocation5 + $0x46c] ss:$20 sps:$4 sm:$0xff]  }
  0xb7   :  { %2300 = vmatpush2.bf16.msra.mxu0 %v3884_v2  ;;  %v3972_v2 = vld [vmem:[#allocation5 + $0x1e8] ss:$20 sps:$4 sm:$0xff]  }
  0xb8   :  { %2341 = vmatpush2.bf16.msra.mxu1 %v3887_v3  ;;  %2301 = vmatprep.subr.bf16.mxu0 %v3892_v4  ;;  %v3975_v3 = vld [vmem:[#allocation5 + $0x468] ss:$20 sps:$4 sm:$0xff]   ;;  %v3980_v4 = vld [vmem:[#allocation5 + $0x1c4] ss:$20 sps:$4 sm:$0xff]  }
  0xb9   :  { %2342 = vmatprep.subr.bf16.mxu1 %v3895_v5  ;;  %v3983_v5 = vld [vmem:[#allocation5 + $0x444] ss:$20 sps:$4 sm:$0xff]  }
  0xbb   :  { %2302 = vmatpush2.bf16.msra.mxu0 %v3890_v8  ;;  %v3978_v8 = vld [vmem:[#allocation5 + $0x1c0] ss:$20 sps:$4 sm:$0xff]  }
  0xbc   :  { %2343 = vmatpush2.bf16.msra.mxu1 %v3893_v9  ;;  %2303 = vmatprep.subr.bf16.mxu0 %v3898_v10  ;;  %v3981_v9 = vld [vmem:[#allocation5 + $0x440] ss:$20 sps:$4 sm:$0xff]   ;;  %v3986_v10 = vld [vmem:[#allocation5 + $0x19c] ss:$20 sps:$4 sm:$0xff]  }
  0xbd   :  { %2344 = vmatprep.subr.bf16.mxu1 %v3901_v11  ;;  %v3989_v11 = vld [vmem:[#allocation5 + $0x41c] ss:$20 sps:$4 sm:$0xff]  }
  0xbf   :  { %2304 = vmatpush2.bf16.msra.mxu0 %v3896_v12  ;;  %v3984_v12 = vld [vmem:[#allocation5 + $0x198] ss:$20 sps:$4 sm:$0xff]  }
  0xc0   :  { %2345 = vmatpush2.bf16.msra.mxu1 %v3899_v13  ;;  %2355 = vmatprep.subr.bf16.mxu0 %v3908_v14  ;;  %v3987_v13 = vld [vmem:[#allocation5 + $0x418] ss:$20 sps:$4 sm:$0xff]   ;;  %v474_v14 = vlaneseq }
  0xc1   :  { %2396 = vmatprep.subr.bf16.mxu1 %v3911_v15  ;;  %v3992_v15 = vld [vmem:[#allocation5 + $0x174] ss:$20 sps:$4 sm:$0xff]  }
  0xc2   :  { %2306 = vmatmul.mubr.bf16.vlgmr.msra.gmra.mxu0 %v4419_v16 }
  0xc3   :  { %2347 = vmatmul.mubr.bf16.vlgmr.msra.gmra.mxu1 %v4423_v17  ;;  %2356 = vmatpush1.bf16.msra.mxu0 %v3906_v18  ;;  %v3995_v18 = vld [vmem:[#allocation5 + $0x3f4] ss:$20 sps:$4 sm:$0xff]  }
  0xc4   :  { %2397 = vmatpush1.bf16.msra.mxu1 %v3909_v19  ;;  %2357 = vmatprep.subr.bf16.mxu0 %v3914_v20  ;;  %v3990_v19 = vld [vmem:[#allocation5 + $0x170] ss:$20 sps:$4 sm:$0xff]  }
  0xc5   :  { %2398 = vmatprep.subr.bf16.mxu1 %v3917_v21  ;;  %2387 = vmatprep.mubr.bf16.mxu0 %v4391_v47  ;;  %v3993_v20 = vld [vmem:[#allocation5 + $0x3f0] ss:$20 sps:$4 sm:$0xff]   ;;  %v4429_v21 = vshrl.u32 %v474_v14, 7  ;;  %v4073_v14 = vld [vmem:[#allocation5 + $0x96c] ss:$20 sps:$4 sm:$0xff]  }
  0xc6   :  { %2428 = vmatprep.mubr.bf16.mxu1 %v4393_v51 }
  0xc7   :  { %2358 = vmatpush1.bf16.msra.mxu0 %v3912_v22  ;;  %v3998_v22 = vld [vmem:[#allocation5 + $0x14c] ss:$20 sps:$4 sm:$0xff]  }
  0xc8   :  { %2399 = vmatpush1.bf16.msra.mxu1 %v3915_v23  ;;  %2359 = vmatprep.subr.bf16.mxu0 %v3920_v24  ;;  %v4001_v23 = vld [vmem:[#allocation5 + $0x3cc] ss:$20 sps:$4 sm:$0xff]   ;;  %v3996_v24 = vld [vmem:[#allocation5 + $0x148] ss:$20 sps:$4 sm:$0xff]  }
  0xc9   :  { %2400 = vmatprep.subr.bf16.mxu1 %v3923_v25  ;;  %v3999_v25 = vld [vmem:[#allocation5 + $0x3c8] ss:$20 sps:$4 sm:$0xff]  }
  0xcb   :  { %2360 = vmatpush1.bf16.msra.mxu0 %v3918_v26  ;;  %v476_v26 = vsub.s32 0, %v4429_v21 }
  0xcc   :  { %2401 = vmatpush1.bf16.msra.mxu1 %v3921_v27  ;;  %2361 = vmatprep.subr.bf16.mxu0 %v3926_v28  ;;  %v4004_v27 = vld [vmem:[#allocation5 + $0x624] ss:$20 sps:$4 sm:$0xff]  }
  0xcd   :  { %2402 = vmatprep.subr.bf16.mxu1 %v3929_v29  ;;  %v4007_v28 = vld [vmem:[#allocation5 + $0x8a4] ss:$20 sps:$4 sm:$0xff]   ;;  %v4002_v29 = vld [vmem:[#allocation5 + $0x620] ss:$20 sps:$4 sm:$0xff]  }
  0xcf   :  { %2362 = vmatpush1.bf16.msra.mxu0 %v3924_v30  ;;  %v4005_v30 = vld [vmem:[#allocation5 + $0x8a0] ss:$20 sps:$4 sm:$0xff]  }
  0xd0   :  { %2403 = vmatpush1.bf16.msra.mxu1 %v3927_v31  ;;  %2363 = vmatprep.subr.bf16.mxu0 %v3932_v32  ;;  %v4010_v31 = vld [vmem:[#allocation5 + $0x5fc] ss:$20 sps:$4 sm:$0xff]  }
  0xd1   :  { %2404 = vmatprep.subr.bf16.mxu1 %v3935_v33  ;;  %v4013_v32 = vld [vmem:[#allocation5 + $0x87c] ss:$20 sps:$4 sm:$0xff]   ;;  %v4008_v33 = vld [vmem:[#allocation5 + $0x5f8] ss:$20 sps:$4 sm:$0xff]  }
  0xd3   :  { %2364 = vmatpush1.bf16.msra.mxu0 %v3930_v34  ;;  %v4011_v34 = vld [vmem:[#allocation5 + $0x878] ss:$20 sps:$4 sm:$0xff]  }
  0xd4   :  { %2405 = vmatpush1.bf16.msra.mxu1 %v3933_v35  ;;  %2365 = vmatprep.subr.bf16.mxu0 %v3938_v38  ;;  %v4016_v35 = vld [vmem:[#allocation5 + $0x5d4] ss:$20 sps:$4 sm:$0xff]  }
  0xd5   :  { %2406 = vmatprep.subr.bf16.mxu1 %v3941_v39  ;;  %v4019_v38 = vld [vmem:[#allocation5 + $0x854] ss:$20 sps:$4 sm:$0xff]   ;;  %v4014_v39 = vld [vmem:[#allocation5 + $0x5d0] ss:$20 sps:$4 sm:$0xff]  }
  0xd7   :  { %2366 = vmatpush1.bf16.msra.mxu0 %v3936_v40  ;;  %v4017_v40 = vld [vmem:[#allocation5 + $0x850] ss:$20 sps:$4 sm:$0xff]  }
  0xd8   :  { %2407 = vmatpush1.bf16.msra.mxu1 %v3939_v41  ;;  %2367 = vmatprep.subr.bf16.mxu0 %v3944_v42  ;;  %v4022_v41 = vld [vmem:[#allocation5 + $0x5ac] ss:$20 sps:$4 sm:$0xff]  }
  0xd9   :  { %2408 = vmatprep.subr.bf16.mxu1 %v3947_v43  ;;  %v4025_v42 = vld [vmem:[#allocation5 + $0x82c] ss:$20 sps:$4 sm:$0xff]   ;;  %v4020_v43 = vld [vmem:[#allocation5 + $0x5a8] ss:$20 sps:$4 sm:$0xff]  }
  0xdb   :  { %2368 = vmatpush1.bf16.msra.mxu0 %v3942_v44  ;;  %v4023_v44 = vld [vmem:[#allocation5 + $0x828] ss:$20 sps:$4 sm:$0xff]  }
  0xdc   :  { %2409 = vmatpush1.bf16.msra.mxu1 %v3945_v45  ;;  %2369 = vmatprep.subr.bf16.mxu0 %v3950_v46  ;;  %v4028_v45 = vld [vmem:[#allocation5 + $0x584] ss:$20 sps:$4 sm:$0xff]  }
  0xdd   :  { %2410 = vmatprep.subr.bf16.mxu1 %v3953_v48  ;;  %v4031_v46 = vld [vmem:[#allocation5 + $0x804] ss:$20 sps:$4 sm:$0xff]   ;;  %v4026_v48 = vld [vmem:[#allocation5 + $0x580] ss:$20 sps:$4 sm:$0xff]  }
  0xdf   :  { %2370 = vmatpush1.bf16.msra.mxu0 %v3948_v49  ;;  %v4029_v49 = vld [vmem:[#allocation5 + $0x800] ss:$20 sps:$4 sm:$0xff]  }
  0xe0   :  { %2411 = vmatpush1.bf16.msra.mxu1 %v3951_v50  ;;  %2371 = vmatprep.subr.bf16.mxu0 %v3956_v52  ;;  %v4034_v50 = vld [vmem:[#allocation5 + $0x55c] ss:$20 sps:$4 sm:$0xff]  }
  0xe1   :  { %2412 = vmatprep.subr.bf16.mxu1 %v3959_v53  ;;  %v4037_v52 = vld [vmem:[#allocation5 + $0x7dc] ss:$20 sps:$4 sm:$0xff]   ;;  %v4032_v53 = vld [vmem:[#allocation5 + $0x558] ss:$20 sps:$4 sm:$0xff]  }
  0xe3   :  { %2372 = vmatpush2.bf16.msra.mxu0 %v3954_v54  ;;  %v4035_v54 = vld [vmem:[#allocation5 + $0x7d8] ss:$20 sps:$4 sm:$0xff]  }
  0xe4   :  { %2413 = vmatpush2.bf16.msra.mxu1 %v3957_v55  ;;  %2373 = vmatprep.subr.bf16.mxu0 %v3962_v56  ;;  %v4040_v55 = vld [vmem:[#allocation5 + $0x534] ss:$20 sps:$4 sm:$0xff]  }
  0xe5   :  { %2414 = vmatprep.subr.bf16.mxu1 %v3965_v57  ;;  %v4043_v56 = vld [vmem:[#allocation5 + $0x7b4] ss:$20 sps:$4 sm:$0xff]   ;;  %v4038_v57 = vld [vmem:[#allocation5 + $0x530] ss:$20 sps:$4 sm:$0xff]  }
  0xe7   :  { %2374 = vmatpush2.bf16.msra.mxu0 %v3960_v58  ;;  %v4041_v58 = vld [vmem:[#allocation5 + $0x7b0] ss:$20 sps:$4 sm:$0xff]  }
  0xe8   :  { %2415 = vmatpush2.bf16.msra.mxu1 %v3963_v59  ;;  %2375 = vmatprep.subr.bf16.mxu0 %v3968_v60  ;;  %v4046_v59 = vld [vmem:[#allocation5 + $0x50c] ss:$20 sps:$4 sm:$0xff]  }
  0xe9   :  { %2416 = vmatprep.subr.bf16.mxu1 %v3971_v61  ;;  %v4049_v60 = vld [vmem:[#allocation5 + $0x78c] ss:$20 sps:$4 sm:$0xff]   ;;  %v4044_v61 = vld [vmem:[#allocation5 + $0x508] ss:$20 sps:$4 sm:$0xff]  }
  0xeb   :  { %2376 = vmatpush2.bf16.msra.mxu0 %v3966_v62  ;;  %v4047_v62 = vld [vmem:[#allocation5 + $0x788] ss:$20 sps:$4 sm:$0xff]  }
  0xec   :  { %2417 = vmatpush2.bf16.msra.mxu1 %v3969_v63  ;;  %2377 = vmatprep.subr.bf16.mxu0 %v3974_v0  ;;  %v4052_v63 = vld [vmem:[#allocation5 + $0x764] ss:$20 sps:$4 sm:$0xff]  }
  0xed   :  { %2418 = vmatprep.subr.bf16.mxu1 %v3977_v1  ;;  %v4055_v0 = vld [vmem:[#allocation5 + $0x9e4] ss:$20 sps:$4 sm:$0xff]   ;;  %v4050_v1 = vld [vmem:[#allocation5 + $0x760] ss:$20 sps:$4 sm:$0xff]  }
  0xef   :  { %2378 = vmatpush2.bf16.msra.mxu0 %v3972_v2  ;;  %v4053_v2 = vld [vmem:[#allocation5 + $0x9e0] ss:$20 sps:$4 sm:$0xff]  }
  0xf0   :  { %2419 = vmatpush2.bf16.msra.mxu1 %v3975_v3  ;;  %2379 = vmatprep.subr.bf16.mxu0 %v3980_v4  ;;  %v4058_v3 = vld [vmem:[#allocation5 + $0x73c] ss:$20 sps:$4 sm:$0xff]  }
  0xf1   :  { %2420 = vmatprep.subr.bf16.mxu1 %v3983_v5  ;;  %v4061_v4 = vld [vmem:[#allocation5 + $0x9bc] ss:$20 sps:$4 sm:$0xff]   ;;  %v4056_v5 = vld [vmem:[#allocation5 + $0x738] ss:$20 sps:$4 sm:$0xff]  }
  0xf3   :  { %2380 = vmatpush2.bf16.msra.mxu0 %v3978_v8  ;;  %v4059_v8 = vld [vmem:[#allocation5 + $0x9b8] ss:$20 sps:$4 sm:$0xff]  }
  0xf4   :  { %2421 = vmatpush2.bf16.msra.mxu1 %v3981_v9  ;;  %2381 = vmatprep.subr.bf16.mxu0 %v3986_v10  ;;  %v4064_v9 = vld [vmem:[#allocation5 + $0x714] ss:$20 sps:$4 sm:$0xff]  }
  0xf5   :  { %2422 = vmatprep.subr.bf16.mxu1 %v3989_v11  ;;  %v4067_v10 = vld [vmem:[#allocation5 + $0x994] ss:$20 sps:$4 sm:$0xff]   ;;  %v4062_v11 = vld [vmem:[#allocation5 + $0x710] ss:$20 sps:$4 sm:$0xff]  }
  0xf7   :  { %2382 = vmatpush2.bf16.msra.mxu0 %v3984_v12  ;;  %v4065_v12 = vld [vmem:[#allocation5 + $0x990] ss:$20 sps:$4 sm:$0xff]  }
  0xf8   :  { %2423 = vmatpush2.bf16.msra.mxu1 %v3987_v13  ;;  %2383 = vmatprep.subr.bf16.mxu0 %v3992_v15  ;;  %v4070_v13 = vld [vmem:[#allocation5 + $0x6ec] ss:$20 sps:$4 sm:$0xff]   ;;  %v4068_v15 = vld [vmem:[#allocation5 + $0x6e8] ss:$20 sps:$4 sm:$0xff]  }
  0xf9   :  { %2424 = vmatprep.subr.bf16.mxu1 %v3995_v18  ;;  %v4071_v18 = vld [vmem:[#allocation5 + $0x968] ss:$20 sps:$4 sm:$0xff]  }
  0xfb   :  { %2384 = vmatpush2.bf16.msra.mxu0 %v3990_v19  ;;  %v4076_v19 = vld [vmem:[#allocation5 + $0x6c4] ss:$20 sps:$4 sm:$0xff]  }
  0xfc   :  { %2425 = vmatpush2.bf16.msra.mxu1 %v3993_v20  ;;  %2385 = vmatprep.subr.bf16.mxu0 %v3998_v22  ;;  %v4079_v20 = vld [vmem:[#allocation5 + $0x944] ss:$20 sps:$4 sm:$0xff]   ;;  %v4074_v22 = vld [vmem:[#allocation5 + $0x6c0] ss:$20 sps:$4 sm:$0xff]  }
  0xfd   :  { %2426 = vmatprep.subr.bf16.mxu1 %v4001_v23  ;;  %v4077_v23 = vld [vmem:[#allocation5 + $0x940] ss:$20 sps:$4 sm:$0xff]  }
  0xff   :  { %2386 = vmatpush2.bf16.msra.mxu0 %v3996_v24  ;;  %v4082_v24 = vld [vmem:[#allocation5 + $0x69c] ss:$20 sps:$4 sm:$0xff]  }
 0x100   :  { %2427 = vmatpush2.bf16.msra.mxu1 %v3999_v25  ;;  %2437 = vmatprep.subr.bf16.mxu0 %v4004_v27  ;;  %v4085_v25 = vld [vmem:[#allocation5 + $0x91c] ss:$20 sps:$4 sm:$0xff]   ;;  %v4080_v27 = vld [vmem:[#allocation5 + $0x698] ss:$20 sps:$4 sm:$0xff]  }
 0x101   :  { %2478 = vmatprep.subr.bf16.mxu1 %v4007_v28  ;;  %v4083_v28 = vld [vmem:[#allocation5 + $0x918] ss:$20 sps:$4 sm:$0xff]  }
 0x102   :  { %2388 = vmatmul.mubr.bf16.vlgmr.msra.gmra.mxu0 %v4397_v6 }
 0x103   :  { %2429 = vmatmul.mubr.bf16.vlgmr.msra.gmra.mxu1 %v4399_v7  ;;  %2438 = vmatpush1.bf16.msra.mxu0 %v4002_v29  ;;  %v4088_v29 = vld [vmem:[#allocation5 + $0x674] ss:$20 sps:$4 sm:$0xff]  }
 0x104   :  { %2479 = vmatpush1.bf16.msra.mxu1 %v4005_v30  ;;  %2439 = vmatprep.subr.bf16.mxu0 %v4010_v31  ;;  %v4091_v30 = vld [vmem:[#allocation5 + $0x8f4] ss:$20 sps:$4 sm:$0xff]   ;;  %v4086_v31 = vld [vmem:[#allocation5 + $0x670] ss:$20 sps:$4 sm:$0xff]  }
 0x105   :  { %2480 = vmatprep.subr.bf16.mxu1 %v4013_v32  ;;  %2469 = vmatprep.mubr.bf16.mxu0 %v4409_v36  ;;  %v4089_v32 = vld [vmem:[#allocation5 + $0x8f0] ss:$20 sps:$4 sm:$0xff]  }
 0x106   :  { %2510 = vmatprep.mubr.bf16.mxu1 %v4413_v37 }
 0x107   :  { %2440 = vmatpush1.bf16.msra.mxu0 %v4008_v33  ;;  %v4094_v33 = vld [vmem:[#allocation5 + $0x64c] ss:$20 sps:$4 sm:$0xff]  }
 0x108   :  { %2481 = vmatpush1.bf16.msra.mxu1 %v4011_v34  ;;  %2441 = vmatprep.subr.bf16.mxu0 %v4016_v35  ;;  %v4097_v34 = vld [vmem:[#allocation5 + $0x8cc] ss:$20 sps:$4 sm:$0xff]   ;;  %v4092_v35 = vld [vmem:[#allocation5 + $0x648] ss:$20 sps:$4 sm:$0xff]  }
 0x109   :  { %2482 = vmatprep.subr.bf16.mxu1 %v4019_v38  ;;  %v4095_v38 = vld [vmem:[#allocation5 + $0x8c8] ss:$20 sps:$4 sm:$0xff]  }
 0x10b   :  { %2442 = vmatpush1.bf16.msra.mxu0 %v4014_v39  ;;  %v4436_v39 = vld [vmem:[#allocation7] sm:$0x1f] }
 0x10c   :  { %2483 = vmatpush1.bf16.msra.mxu1 %v4017_v40  ;;  %2443 = vmatprep.subr.bf16.mxu0 %v4022_v41  ;;  %v4098_v40 = vld [vmem:[#allocation5 + $0x268] ss:$20 sps:$4 sm:$0xff]  }
 0x10d   :  { %2484 = vmatprep.subr.bf16.mxu1 %v4025_v42  ;;  %v4099_v41 = vld [vmem:[#allocation5 + $0x4e8] ss:$20 sps:$4 sm:$0xff]  }
 0x10e   :  { %v4100_v42 = vld [vmem:[#allocation5 + $0x128] ss:$20 sps:$4 sm:$0xff]  }
 0x10f   :  { %2444 = vmatpush1.bf16.msra.mxu0 %v4020_v43  ;;  %v4101_v43 = vld [vmem:[#allocation5 + $0x3a8] ss:$20 sps:$4 sm:$0xff]  }
 0x110   :  { %2485 = vmatpush1.bf16.msra.mxu1 %v4023_v44  ;;  %2445 = vmatprep.subr.bf16.mxu0 %v4028_v45  ;;  %v4102_v44 = vld [vmem:[#allocation5 + $0x240] ss:$20 sps:$4 sm:$0xff]  }
 0x111   :  { %2486 = vmatprep.subr.bf16.mxu1 %v4031_v46  ;;  %v4103_v45 = vld [vmem:[#allocation5 + $0x4c0] ss:$20 sps:$4 sm:$0xff]   ;;  %v477_v46 = vrot.slane %v4436_v39, %v476_v26 }
 0x113   :  { %2446 = vmatpush1.bf16.msra.mxu0 %v4026_v48  ;;  %v4104_v48 = vld [vmem:[#allocation5 + $0x100] ss:$20 sps:$4 sm:$0xff]  }
 0x114   :  { %2487 = vmatpush1.bf16.msra.mxu1 %v4029_v49  ;;  %2447 = vmatprep.subr.bf16.mxu0 %v4034_v50  ;;  %v4105_v49 = vld [vmem:[#allocation5 + $0x380] ss:$20 sps:$4 sm:$0xff]  }
 0x115   :  { %2488 = vmatprep.subr.bf16.mxu1 %v4037_v52 }
 0x117   :  { %2448 = vmatpush1.bf16.msra.mxu0 %v4032_v53  ;;  %v4106_v53 = vld [vmem:[#allocation5 + $0x218] ss:$20 sps:$4 sm:$0xff]  }
 0x118   :  { %2489 = vmatpush1.bf16.msra.mxu1 %v4035_v54  ;;  %2449 = vmatprep.subr.bf16.mxu0 %v4040_v55  ;;  %v4107_v54 = vld [vmem:[#allocation5 + $0x498] ss:$20 sps:$4 sm:$0xff]  }
 0x119   :  { %2490 = vmatprep.subr.bf16.mxu1 %v4043_v56 }
 0x11b   :  { %2450 = vmatpush1.bf16.msra.mxu0 %v4038_v57 }
 0x11c   :  { %2491 = vmatpush1.bf16.msra.mxu1 %v4041_v58  ;;  %2451 = vmatprep.subr.bf16.mxu0 %v4046_v59  ;;  %v4108_v58 = vld [vmem:[#allocation5 + $0xd8] ss:$20 sps:$4 sm:$0xff]  }
 0x11d   :  { %2492 = vmatprep.subr.bf16.mxu1 %v4049_v60  ;;  %v4109_v59 = vld [vmem:[#allocation5 + $0x358] ss:$20 sps:$4 sm:$0xff]  }
 0x11f   :  { %2452 = vmatpush1.bf16.msra.mxu0 %v4044_v61 }
 0x120   :  { %2493 = vmatpush1.bf16.msra.mxu1 %v4047_v62  ;;  %2453 = vmatprep.subr.bf16.mxu0 %v4052_v63 }
 0x121   :  { %2494 = vmatprep.subr.bf16.mxu1 %v4055_v0  ;;  %v4110_v0 = vld [vmem:[#allocation5 + $0x1f0] ss:$20 sps:$4 sm:$0xff]  }
 0x123   :  { %2454 = vmatpush2.bf16.msra.mxu0 %v4050_v1  ;;  %v4111_v1 = vld [vmem:[#allocation5 + $0x470] ss:$20 sps:$4 sm:$0xff]  }
 0x124   :  { %2495 = vmatpush2.bf16.msra.mxu1 %v4053_v2  ;;  %2455 = vmatprep.subr.bf16.mxu0 %v4058_v3  ;;  %v4112_v2 = vld [vmem:[#allocation5 + $0xb0] ss:$20 sps:$4 sm:$0xff]  }
 0x125   :  { %2496 = vmatprep.subr.bf16.mxu1 %v4061_v4  ;;  %v4113_v3 = vld [vmem:[#allocation5 + $0x330] ss:$20 sps:$4 sm:$0xff]   ;;  %v4114_v4 = vld [vmem:[#allocation5 + $0x1c8] ss:$20 sps:$4 sm:$0xff]  }
 0x127   :  { %2456 = vmatpush2.bf16.msra.mxu0 %v4056_v5  ;;  %v4115_v5 = vld [vmem:[#allocation5 + $0x448] ss:$20 sps:$4 sm:$0xff]  }
 0x128   :  { %2497 = vmatpush2.bf16.msra.mxu1 %v4059_v8  ;;  %2457 = vmatprep.subr.bf16.mxu0 %v4064_v9  ;;  %v4118_v8 = vld [vmem:[#allocation5 + $0x1a0] ss:$20 sps:$4 sm:$0xff]  }
 0x129   :  { %2498 = vmatprep.subr.bf16.mxu1 %v4067_v10  ;;  %v4119_v9 = vld [vmem:[#allocation5 + $0x420] ss:$20 sps:$4 sm:$0xff]  }
 0x12a   :  { %v4120_v10 = vld [vmem:[#allocation5 + $0x60] ss:$20 sps:$4 sm:$0xff]  }
 0x12b   :  { %2458 = vmatpush2.bf16.msra.mxu0 %v4062_v11  ;;  %v4121_v11 = vld [vmem:[#allocation5 + $0x2e0] ss:$20 sps:$4 sm:$0xff]  }
 0x12c   :  { %2499 = vmatpush2.bf16.msra.mxu1 %v4065_v12  ;;  %2459 = vmatprep.subr.bf16.mxu0 %v4070_v13  ;;  %v4122_v12 = vld [vmem:[#allocation5 + $0x178] ss:$20 sps:$4 sm:$0xff]  }
 0x12d   :  { %2500 = vmatprep.subr.bf16.mxu1 %v4073_v14  ;;  %v4123_v13 = vld [vmem:[#allocation5 + $0x3f8] ss:$20 sps:$4 sm:$0xff]  }
 0x12e   :  { %v4124_v14 = vld [vmem:[#allocation5 + $0x38] ss:$20 sps:$4 sm:$0xff]  }
 0x12f   :  { %2460 = vmatpush2.bf16.msra.mxu0 %v4068_v15  ;;  %v4125_v15 = vld [vmem:[#allocation5 + $0x2b8] ss:$20 sps:$4 sm:$0xff]  }
 0x130   :  { %2501 = vmatpush2.bf16.msra.mxu1 %v4071_v18  ;;  %2461 = vmatprep.subr.bf16.mxu0 %v4076_v19  ;;  %v4126_v18 = vld [vmem:[#allocation5 + $0x150] ss:$20 sps:$4 sm:$0xff]  }
 0x131   :  { %2502 = vmatprep.subr.bf16.mxu1 %v4079_v20  ;;  %v4127_v19 = vld [vmem:[#allocation5 + $0x3d0] ss:$20 sps:$4 sm:$0xff]  }
 0x132   :  { %v4128_v20 = vld [vmem:[#allocation5 + $0x10] ss:$20 sps:$4 sm:$0xff]  }
 0x133   :  { %2462 = vmatpush2.bf16.msra.mxu0 %v4074_v22  ;;  %v4129_v22 = vld [vmem:[#allocation5 + $0x290] ss:$20 sps:$4 sm:$0xff]  }
 0x134   :  { %2503 = vmatpush2.bf16.msra.mxu1 %v4077_v23  ;;  %2463 = vmatprep.subr.bf16.mxu0 %v4082_v24  ;;  %v4130_v23 = vld [vmem:[#allocation5 + $0x768] ss:$20 sps:$4 sm:$0xff]  }
 0x135   :  { %2504 = vmatprep.subr.bf16.mxu1 %v4085_v25  ;;  %v4131_v24 = vld [vmem:[#allocation5 + $0x9e8] ss:$20 sps:$4 sm:$0xff]  }
 0x136   :  { %v4132_v25 = vld [vmem:[#allocation5 + $0x628] ss:$20 sps:$4 sm:$0xff]  }
 0x137   :  { %2464 = vmatpush2.bf16.msra.mxu0 %v4080_v27  ;;  %v4133_v27 = vld [vmem:[#allocation5 + $0x8a8] ss:$20 sps:$4 sm:$0xff]  }
 0x138   :  { %2505 = vmatpush2.bf16.msra.mxu1 %v4083_v28  ;;  %2465 = vmatprep.subr.bf16.mxu0 %v4088_v29  ;;  %v4134_v28 = vld [vmem:[#allocation5 + $0x740] ss:$20 sps:$4 sm:$0xff]  }
 0x139   :  { %2506 = vmatprep.subr.bf16.mxu1 %v4091_v30  ;;  %v4135_v29 = vld [vmem:[#allocation5 + $0x9c0] ss:$20 sps:$4 sm:$0xff]  }
 0x13a   :  { %v4136_v30 = vld [vmem:[#allocation5 + $0x600] ss:$20 sps:$4 sm:$0xff]  }
 0x13b   :  { %2466 = vmatpush2.bf16.msra.mxu0 %v4086_v31  ;;  %v4137_v31 = vld [vmem:[#allocation5 + $0x880] ss:$20 sps:$4 sm:$0xff]  }
 0x13c   :  { %2507 = vmatpush2.bf16.msra.mxu1 %v4089_v32  ;;  %2467 = vmatprep.subr.bf16.mxu0 %v4094_v33  ;;  %v4138_v32 = vld [vmem:[#allocation5 + $0x718] ss:$20 sps:$4 sm:$0xff]  }
 0x13d   :  { %2508 = vmatprep.subr.bf16.mxu1 %v4097_v34  ;;  %v4139_v33 = vld [vmem:[#allocation5 + $0x998] ss:$20 sps:$4 sm:$0xff]  }
 0x13e   :  { %v4140_v34 = vld [vmem:[#allocation5 + $0x5d8] ss:$20 sps:$4 sm:$0xff]  }
 0x13f   :  { %2468 = vmatpush2.bf16.msra.mxu0 %v4092_v35  ;;  %v4141_v35 = vld [vmem:[#allocation5 + $0x858] ss:$20 sps:$4 sm:$0xff]  }
 0x140   :  { %2509 = vmatpush2.bf16.msra.mxu1 %v4095_v38  ;;  %3533 = vmatprep.subr.bf16.mxu0 %v4098_v40  ;;  %v4144_v38 = vld [vmem:[#allocation5 + $0x5b0] ss:$20 sps:$4 sm:$0xff]  }
 0x141   :  { %3555 = vmatprep.subr.bf16.mxu1 %v4099_v41  ;;  %v4145_v40 = vld [vmem:[#allocation5 + $0x830] ss:$20 sps:$4 sm:$0xff]   ;;  %v4146_v41 = vld [vmem:[#allocation5 + $0x6c8] ss:$20 sps:$4 sm:$0xff]  }
 0x142   :  { %v2225_v50 = vpop.f32.mrf.mxu0  ;;  %2470 = vmatmul.mubr.bf16.vlgmr.msra.gmra.mxu0 %v4419_v16 }
 0x143   :  { %v2266_v52 = vpop.f32.mrf.mxu1  ;;  %2511 = vmatmul.mubr.bf16.vlgmr.msra.gmra.mxu1 %v4423_v17  ;;  %v2226_v55 = vadd.f32 %v2225_v50, %v477_v46  ;;  %3534 = vmatpush3.bf16.msra.mxu0 %v4100_v42  ;;  %v4147_v42 = vld [vmem:[#allocation5 + $0x948] ss:$20 sps:$4 sm:$0xff]   ;;  %v4153_v46 = vld [vmem:[#allocation5 + $0x7e0] ss:$20 sps:$4 sm:$0xff]   ;;  %v480_v50 = vsub.s32 1, %v4429_v21 }
 0x144   :  { %3556 = vmatpush3.bf16.msra.mxu1 %v4101_v43  ;;  %v4443_v56 = vpop.f32.mrf.mxu0  ;;  %3535 = vmatprep.subr.bf16.mxu0 %v4102_v44  ;;  %v4150_v43 = vld [vmem:[#allocation5 + $0x6a0] ss:$20 sps:$4 sm:$0xff]  }
 0x145   :  { %v4445_v57 = vpop.f32.mrf.mxu1  ;;  %3557 = vmatprep.subr.bf16.mxu1 %v4103_v45  ;;  %v4447_v26 = vadd.f32 %v2266_v52, %v2226_v55  ;;  %2551 = vmatprep.mubr.bf16.mxu0 %v4391_v47  ;;  %v4116_v47 = vld [vmem:[#allocation5 + $0x88] ss:$20 sps:$4 sm:$0xff]   ;;  %v4151_v44 = vld [vmem:[#allocation5 + $0x920] ss:$20 sps:$4 sm:$0xff]   ;;  %v4156_v52 = vld [vmem:[#allocation5 + $0x538] ss:$20 sps:$4 sm:$0xff]  }
 0x146   :  { %2591 = vmatprep.mubr.bf16.mxu1 %v4393_v51  ;;  %v2229_v60 = vpop.f32.mrf.mxu0  ;;  %v4117_v51 = vld [vmem:[#allocation5 + $0x308] ss:$20 sps:$4 sm:$0xff]   ;;  %v4152_v45 = vld [vmem:[#allocation5 + $0x560] ss:$20 sps:$4 sm:$0xff]   ;;  %v4159_v55 = vld [vmem:[#allocation5 + $0x8d0] ss:$20 sps:$4 sm:$0xff]  }
 0x147   :  { %v2270_v61 = vpop.f32.mrf.mxu1  ;;  %3536 = vmatpush3.bf16.msra.mxu0 %v4104_v48  ;;  %v4154_v48 = vld [vmem:[#allocation5 + $0x678] ss:$20 sps:$4 sm:$0xff]   ;;  %v4161_v60 = vld [vmem:[#allocation5 + $0x790] ss:$20 sps:$4 sm:$0xff]  }
 0x148   :  { %3558 = vmatpush3.bf16.msra.mxu1 %v4105_v49  ;;  %v2230_v62 = vpop.f32.mrf.mxu0  ;;  %3537 = vmatprep.subr.bf16.mxu0 %v4106_v53  ;;  %v4155_v49 = vld [vmem:[#allocation5 + $0x8f8] ss:$20 sps:$4 sm:$0xff]   ;;  %v4162_v61 = vld [vmem:[#allocation8 + $0x78] sm:$0xff]  }
 0x149   :  { %v2271_v63 = vpop.f32.mrf.mxu1  ;;  %3559 = vmatprep.subr.bf16.mxu1 %v4107_v54  ;;  %v4157_v53 = vld [vmem:[#allocation5 + $0x7b8] ss:$20 sps:$4 sm:$0xff]   ;;  %v4158_v54 = vld [vmem:[#allocation5 + $0x650] ss:$20 sps:$4 sm:$0xff]  }
 0x14a   :  { %v4178_v62 = vld [vmem:[#allocation8 + $0xf8] sm:$0xff]  }
 0x14b   :  { %3538 = vmatpush3.bf16.msra.mxu0 %v4108_v58  ;;  %v481_v58 = vrot.slane %v4436_v39, %v480_v50  ;;  %v4197_v50 = vld [vmem:[#allocation8 + $0x120] sm:$0xff]  }
 0x14c   :  { %3560 = vmatpush3.bf16.msra.mxu1 %v4109_v59  ;;  %3539 = vmatprep.subr.bf16.mxu0 %v4110_v0  ;;  %v4160_v59 = vld [vmem:[#allocation5 + $0x510] ss:$20 sps:$4 sm:$0xff]  }
 0x14d   :  { %3561 = vmatprep.subr.bf16.mxu1 %v4111_v1  ;;  %v2228_v63 = vadd.f32 %v4443_v56, %v481_v58  ;;  %v4163_v0 = vld [vmem:[#allocation8 + $0x38] sm:$0xff]   ;;  %v4181_v56 = vld [vmem:[#allocation8 + $0xb0] sm:$0xff]  }
 0x14e   :  { %v4179_v1 = vld [vmem:[#allocation8 + $0xb8] sm:$0xff]  }
 0x14f   :  { %3540 = vmatpush3.bf16.msra.mxu0 %v4112_v2  ;;  %v4164_v2 = vld [vmem:[#allocation8 + $0x70] sm:$0xff]  }
 0x150   :  { %3562 = vmatpush3.bf16.msra.mxu1 %v4113_v3  ;;  %3541 = vmatprep.subr.bf16.mxu0 %v4114_v4  ;;  %v4180_v3 = vld [vmem:[#allocation8 + $0xf0] sm:$0xff]  }
 0x151   :  { %3563 = vmatprep.subr.bf16.mxu1 %v4115_v5 }
 0x153   :  { %3542 = vmatpush3.bf16.msra.mxu0 %v4116_v47  ;;  %v2269_v47 = vadd.f32 %v4445_v57, %v2228_v63 }
 0x154   :  { %3564 = vmatpush3.bf16.msra.mxu1 %v4117_v51  ;;  %3543 = vmatprep.subr.bf16.mxu0 %v4118_v8  ;;  %v4165_v51 = vld [vmem:[#allocation8 + $0x30] sm:$0xff]  }
 0x155   :  { %3565 = vmatprep.subr.bf16.mxu1 %v4119_v9 }
 0x157   :  { %3544 = vmatpush3.bf16.msra.mxu0 %v4120_v10  ;;  %v4166_v10 = vld [vmem:[#allocation8 + $0x68] sm:$0xff]  }
 0x158   :  { %3566 = vmatpush3.bf16.msra.mxu1 %v4121_v11  ;;  %3545 = vmatprep.subr.bf16.mxu0 %v4122_v12  ;;  %v4182_v11 = vld [vmem:[#allocation8 + $0xe8] sm:$0xff]  }
 0x159   :  { %3567 = vmatprep.subr.bf16.mxu1 %v4123_v13 }
 0x15b   :  { %3546 = vmatpush3.bf16.msra.mxu0 %v4124_v14 }
 0x15c   :  { %3568 = vmatpush3.bf16.msra.mxu1 %v4125_v15  ;;  %3547 = vmatprep.subr.bf16.mxu0 %v4126_v18 }
 0x15d   :  { %3569 = vmatprep.subr.bf16.mxu1 %v4127_v19  ;;  %v4168_v19 = vld [vmem:[#allocation8 + $0x60] sm:$0xff]  }
 0x15f   :  { %3548 = vmatpush3.bf16.msra.mxu0 %v4128_v20  ;;  %v4184_v20 = vld [vmem:[#allocation8 + $0xe0] sm:$0xff]  }
 0x160   :  { %3570 = vmatpush3.bf16.msra.mxu1 %v4129_v22  ;;  %3577 = vmatprep.subr.bf16.mxu0 %v4130_v23 }
 0x161   :  { %3599 = vmatprep.subr.bf16.mxu1 %v4131_v24  ;;  %v4169_v24 = vld [vmem:[#allocation8 + $0x20] sm:$0xff]  }
 0x162   :  { %2552 = vmatmul.mubr.bf16.vlgmr.msra.gmra.mxu0 %v4397_v6  ;;  %v4142_v6 = vld [vmem:[#allocation5 + $0x6f0] ss:$20 sps:$4 sm:$0xff]  }
 0x163   :  { %2592 = vmatmul.mubr.bf16.vlgmr.msra.gmra.mxu1 %v4399_v7  ;;  %3578 = vmatpush3.bf16.msra.mxu0 %v4132_v25  ;;  %v4143_v7 = vld [vmem:[#allocation5 + $0x970] ss:$20 sps:$4 sm:$0xff]  }
 0x164   :  { %3600 = vmatpush3.bf16.msra.mxu1 %v4133_v27  ;;  %3579 = vmatprep.subr.bf16.mxu0 %v4134_v28  ;;  %v4185_v25 = vld [vmem:[#allocation8 + $0xa0] sm:$0xff]   ;;  %v4170_v27 = vld [vmem:[#allocation8 + $0x58] sm:$0xff]  }
 0x165   :  { %3601 = vmatprep.subr.bf16.mxu1 %v4135_v29  ;;  %2631 = vmatprep.mubr.bf16.mxu0 %v4409_v36  ;;  %v4148_v36 = vld [vmem:[#allocation5 + $0x588] ss:$20 sps:$4 sm:$0xff]  }
 0x166   :  { %2671 = vmatprep.mubr.bf16.mxu1 %v4413_v37  ;;  %v4149_v37 = vld [vmem:[#allocation5 + $0x808] ss:$20 sps:$4 sm:$0xff]  }
 0x167   :  { %3580 = vmatpush3.bf16.msra.mxu0 %v4136_v30  ;;  %v4186_v28 = vld [vmem:[#allocation8 + $0xd8] sm:$0xff]  }
 0x168   :  { %3602 = vmatpush3.bf16.msra.mxu1 %v4137_v31  ;;  %3581 = vmatprep.subr.bf16.mxu0 %v4138_v32  ;;  %v4171_v29 = vld [vmem:[#allocation8 + $0x18] sm:$0xff]   ;;  %v4172_v31 = vld [vmem:[#allocation8 + $0x50] sm:$0xff]  }
 0x169   :  { %3603 = vmatprep.subr.bf16.mxu1 %v4139_v33  ;;  %v4187_v30 = vld [vmem:[#allocation8 + $0x98] sm:$0xff]   ;;  %v4188_v32 = vld [vmem:[#allocation8 + $0xd0] sm:$0xff]  }
 0x16a   :  { %v4173_v33 = vld [vmem:[#allocation8 + $0x10] sm:$0xff]  }
 0x16b   :  { %3582 = vmatpush3.bf16.msra.mxu0 %v4140_v34  ;;  %v4189_v34 = vld [vmem:[#allocation8 + $0x90] sm:$0xff]  }
 0x16c   :  { %3604 = vmatpush3.bf16.msra.mxu1 %v4141_v35  ;;  %3583 = vmatprep.subr.bf16.mxu0 %v4142_v6  ;;  %v4174_v6 = vld [vmem:[#allocation8 + $0x48] sm:$0xff]  }
 0x16d   :  { %3605 = vmatprep.subr.bf16.mxu1 %v4143_v7  ;;  %v4190_v7 = vld [vmem:[#allocation8 + $0xc8] sm:$0xff]  }
 0x16f   :  { %3584 = vmatpush3.bf16.msra.mxu0 %v4144_v38  ;;  %v4175_v38 = vld [vmem:[#allocation8 + $0x8] sm:$0xff]  }
 0x170   :  { %3606 = vmatpush3.bf16.msra.mxu1 %v4145_v40  ;;  %3585 = vmatprep.subr.bf16.mxu0 %v4146_v41  ;;  %v4191_v40 = vld [vmem:[#allocation8 + $0x88] sm:$0xff]  }
 0x171   :  { %3607 = vmatprep.subr.bf16.mxu1 %v4147_v42  ;;  %v4176_v42 = vld [vmem:[#allocation8 + $0x40] sm:$0xff]  }
 0x173   :  { %3586 = vmatpush3.bf16.msra.mxu0 %v4148_v36  ;;  %v4192_v36 = vld [vmem:[#allocation8 + $0xc0] sm:$0xff]  }
 0x174   :  { %3608 = vmatpush3.bf16.msra.mxu1 %v4149_v37  ;;  %3587 = vmatprep.subr.bf16.mxu0 %v4150_v43  ;;  %v4177_v37 = vld [vmem:[#allocation8] sm:$0xff]  }
 0x175   :  { %3609 = vmatprep.subr.bf16.mxu1 %v4151_v44  ;;  %v4193_v43 = vld [vmem:[#allocation8 + $0x80] sm:$0xff]  }
 0x177   :  { %3588 = vmatpush3.bf16.msra.mxu0 %v4152_v45  ;;  %v4194_v45 = vld [vmem:[#allocation8 + $0x138] sm:$0xff]  }
 0x178   :  { %3610 = vmatpush3.bf16.msra.mxu1 %v4153_v46  ;;  %3589 = vmatprep.subr.bf16.mxu0 %v4154_v48  ;;  %v4343_v46 = vmov 0.0   ;;  %v4195_v48 = vld [vmem:[#allocation8 + $0x130] sm:$0xff]  }
 0x179   :  { %3611 = vmatprep.subr.bf16.mxu1 %v4155_v49  ;;  %v4196_v49 = vld [vmem:[#allocation8 + $0x128] sm:$0xff]  }
 0x17b   :  { %3590 = vmatpush3.bf16.msra.mxu0 %v4156_v52  ;;  %v4198_v52 = vld [vmem:[#allocation8 + $0x118] sm:$0xff]  }
 0x17c   :  { %3612 = vmatpush3.bf16.msra.mxu1 %v4157_v53  ;;  %3591 = vmatprep.subr.bf16.mxu0 %v4158_v54 }
 0x17d   :  { %3613 = vmatprep.subr.bf16.mxu1 %v4159_v55  ;;  %v4199_v55 = vld [vmem:[#allocation8 + $0x110] sm:$0xff]  }
 0x17f   :  { %3592 = vmatpush3.bf16.msra.mxu0 %v4160_v59 }
 0x180   :  { %3614 = vmatpush3.bf16.msra.mxu1 %v4161_v60  ;;  %3621 = vmatprep.subr.bf16.mxu0 %v4162_v61 }
 0x181   :  { %3643 = vmatprep.subr.bf16.mxu1 %v4178_v62  ;;  %v4200_v62 = vld [vmem:[#allocation8 + $0x108] sm:$0xff]  }
 0x182   :  { %v2307_v4 = vpop.f32.mrf.mxu0  ;;  %2632 = vmatmul.mubr.bf16.vlgmr.msra.gmra.mxu0 %v4419_v16  ;;  %v4167_v16 = vld [vmem:[#allocation8 + $0x28] sm:$0xff]  }
 0x183   :  { %v2348_v5 = vpop.f32.mrf.mxu1  ;;  %2672 = vmatmul.mubr.bf16.vlgmr.msra.gmra.mxu1 %v4423_v17  ;;  %3622 = vmatpush3.bf16.msra.mxu0 %v4163_v0  ;;  %v4183_v17 = vld [vmem:[#allocation8 + $0xa8] sm:$0xff]   ;;  %v2308_v35 = vadd.f32 %v2307_v4, %v4447_v26 }
 0x184   :  { %3644 = vmatpush3.bf16.msra.mxu1 %v4179_v1  ;;  %v2309_v8 = vpop.f32.mrf.mxu0  ;;  %3623 = vmatprep.subr.bf16.mxu0 %v4164_v2  ;;  %v4201_v1 = vld [vmem:[#allocation8 + $0x100] sm:$0xff]   ;;  %v484_v2 = vsub.s32 2, %v4429_v21 }
 0x185   :  { %v2350_v9 = vpop.f32.mrf.mxu1  ;;  %3645 = vmatprep.subr.bf16.mxu1 %v4180_v3  ;;  %v2310_v12 = vadd.f32 %v2309_v8, %v2269_v47  ;;  %v2349_v41 = vadd.f32 %v2348_v5, %v2308_v35  ;;  %v488_v3 = vsub.s32 3, %v4429_v21 }
 0x186   :  { %v2311_v13 = vpop.f32.mrf.mxu0  ;;  %v485_v4 = vrot.slane %v4436_v39, %v484_v2 }
 0x187   :  { %v2352_v14 = vpop.f32.mrf.mxu1  ;;  %v2351_v15 = vadd.f32 %v2350_v9, %v2310_v12  ;;  %3624 = vmatpush3.bf16.msra.mxu0 %v4165_v51  ;;  %v2679_v44 = vmax.f32 %v2349_v41, 0.0  ;;  %v489_v5 = vrot.slane %v4436_v39, %v488_v3 }
 0x188   :  { %3646 = vmatpush3.bf16.msra.mxu1 %v4181_v56  ;;  %v2312_v18 = vpop.f32.mrf.mxu0  ;;  %3625 = vmatprep.subr.bf16.mxu0 %v4166_v10 }
 0x189   :  { %v2353_v57 = vpop.f32.mrf.mxu1  ;;  %3647 = vmatprep.subr.bf16.mxu1 %v4182_v11  ;;  %v2680_v22 = vmax.f32 %v2351_v15, 0.0  ;;  %v2684_v26 = vpack.c.bf16 %v2679_v44, %v2679_v44 }
 0x18b   :  { %v2685_v23 = vpack.c.bf16 %v2680_v22, %v2680_v22  ;;  %3626 = vmatpush3.bf16.msra.mxu0 %v4167_v16 }
 0x18c   :  { %3648 = vmatpush3.bf16.msra.mxu1 %v4183_v17  ;;  %3627 = vmatprep.subr.bf16.mxu0 %v4168_v19 }
 0x18d   :  { %3649 = vmatprep.subr.bf16.mxu1 %v4184_v20  ;;  %3048 = vmatprep.mubr.bf16.mxu0 %v2685_v23 }
 0x18f   :  { %3628 = vmatpush3.bf16.msra.mxu0 %v4169_v24 }
 0x190   :  { %3650 = vmatpush3.bf16.msra.mxu1 %v4185_v25  ;;  %3629 = vmatprep.subr.bf16.mxu0 %v4170_v27 }
 0x191   :  { %3651 = vmatprep.subr.bf16.mxu1 %v4186_v28 }
 0x193   :  { %3630 = vmatpush3.bf16.msra.mxu0 %v4171_v29 }
 0x194   :  { %3652 = vmatpush3.bf16.msra.mxu1 %v4187_v30  ;;  %3631 = vmatprep.subr.bf16.mxu0 %v4172_v31 }
 0x195   :  { %3653 = vmatprep.subr.bf16.mxu1 %v4188_v32 }
 0x197   :  { %3632 = vmatpush3.bf16.msra.mxu0 %v4173_v33 }
 0x198   :  { %3654 = vmatpush3.bf16.msra.mxu1 %v4189_v34  ;;  %3633 = vmatprep.subr.bf16.mxu0 %v4174_v6  ;;  %v492_v34 = vsub.s32 4, %v4429_v21 }
 0x199   :  { %3655 = vmatprep.subr.bf16.mxu1 %v4190_v7 }
 0x19a   :  { %v493_v35 = vrot.slane %v4436_v39, %v492_v34 }
 0x19b   :  { %3634 = vmatpush3.bf16.msra.mxu0 %v4175_v38 }
 0x19c   :  { %3656 = vmatpush3.bf16.msra.mxu1 %v4191_v40  ;;  %3635 = vmatprep.subr.bf16.mxu0 %v4176_v42 }
 0x19d   :  { %3657 = vmatprep.subr.bf16.mxu1 %v4192_v36 }
 0x19f   :  { %3636 = vmatpush3.bf16.msra.mxu0 %v4177_v37 }
 0x1a0   :  { %3658 = vmatpush3.bf16.msra.mxu1 %v4193_v43  ;;  %3674 = vmatprep.subr.bf16.mxu0 %v4343_v46 }
 0x1a2   :  { %3049 = vmatmul.mubr.bf16.vlgmr.msra.gmra.mxu0 %v2684_v26 }
 0x1a3   :  { %3675 = vmatpush3.bf16.msra.mxu0 %v4194_v45  ;;  %3690 = vmatprep.mubr.msk.bf16.mxu0 %vm4344_vm0, %v4343_v46 }
 0x1a4   :  { %3676 = vmatprep.subr.bf16.mxu0 %v4343_v46 }
 0x1a7   :  { %3677 = vmatpush3.bf16.msra.mxu0 %v4195_v48 }
 0x1a8   :  { %3678 = vmatprep.subr.bf16.mxu0 %v4343_v46 }
 0x1ab   :  { %3679 = vmatpush3.bf16.msra.mxu0 %v4196_v49 }
 0x1ac   :  { %3680 = vmatprep.subr.bf16.mxu0 %v4343_v46 }
 0x1af   :  { %3681 = vmatpush3.bf16.msra.mxu0 %v4197_v50 }
 0x1b0   :  { %3682 = vmatprep.subr.bf16.mxu0 %v4343_v46 }
 0x1b3   :  { %3683 = vmatpush3.bf16.msra.mxu0 %v4198_v52 }
 0x1b4   :  { %3684 = vmatprep.subr.bf16.mxu0 %v4343_v46 }
 0x1b7   :  { %3685 = vmatpush3.bf16.msra.mxu0 %v4199_v55 }
 0x1b8   :  { %3686 = vmatprep.subr.bf16.mxu0 %v4343_v46 }
 0x1bb   :  { %3687 = vmatpush3.bf16.msra.mxu0 %v4200_v62 }
 0x1bc   :  { %3688 = vmatprep.subr.bf16.mxu0 %v4343_v46 }
 0x1bf   :  { %3689 = vmatpush3.bf16.msra.mxu0 %v4201_v1 }
 0x1c2   :  { %v2389_v53 = vpop.f32.mrf.mxu0 }
 0x1c3   :  { %v2430_v54 = vpop.f32.mrf.mxu1  ;;  %v2390_v47 = vadd.f32 %v2389_v53, %v485_v4 }
 0x1c4   :  { %v2391_v58 = vpop.f32.mrf.mxu0 }
 0x1c5   :  { %v2432_v59 = vpop.f32.mrf.mxu1  ;;  %v2392_v51 = vadd.f32 %v2391_v58, %v489_v5  ;;  %v2431_v56 = vadd.f32 %v2430_v54, %v2390_v47 }
 0x1c6   :  { %v2393_v60 = vpop.f32.mrf.mxu0 }
 0x1c7   :  { %v2434_v61 = vpop.f32.mrf.mxu1  ;;  %v2433_v10 = vadd.f32 %v2432_v59, %v2392_v51 }
 0x1c8   :  { %v2394_v63 = vpop.f32.mrf.mxu0 }
 0x1c9   :  { %v2435_v0 = vpop.f32.mrf.mxu1  ;;  %v3492_v63 = vld [vmem:[#allocation10] ss:$0 sm:$0xff] }
 0x202   :  { %v2471_v8 = vpop.f32.mrf.mxu0 }
 0x203   :  { %v2512_v9 = vpop.f32.mrf.mxu1  ;;  %v2472_v11 = vadd.f32 %v2471_v8, %v2431_v56 }
 0x204   :  { %v2473_v12 = vpop.f32.mrf.mxu0 }
 0x205   :  { %v2514_v13 = vpop.f32.mrf.mxu1  ;;  %v2513_v14 = vadd.f32 %v2512_v9, %v2472_v11  ;;  %v2474_v15 = vadd.f32 %v2473_v12, %v2433_v10 }
 0x206   :  { %v2475_v16 = vpop.f32.mrf.mxu0 }
 0x207   :  { %v2516_v17 = vpop.f32.mrf.mxu1  ;;  %v2515_v18 = vadd.f32 %v2514_v13, %v2474_v15  ;;  %v2681_v57 = vmax.f32 %v2513_v14, 0.0 }
 0x208   :  { %v2476_v19 = vpop.f32.mrf.mxu0 }
 0x209   :  { %v2517_v20 = vpop.f32.mrf.mxu1  ;;  %v2682_v22 = vmax.f32 %v2515_v18, 0.0  ;;  %v2686_v24 = vpack.c.bf16 %v2681_v57, %v2681_v57 }
 0x20b   :  { %v2687_v23 = vpack.c.bf16 %v2682_v22, %v2682_v22 }
 0x20d   :  { %3088 = vmatprep.mubr.bf16.mxu1 %v2687_v23 }
 0x20e   :  { %3089 = vmatmul.mubr.bf16.vlgmr.msra.gmra.mxu1 %v2686_v24 }
 0x222   :  { %v3549_v25 = vpop.f32.mrf.mxu0 }
 0x223   :  { %v3571_v27 = vpop.f32.mrf.mxu1 }
 0x224   :  { %v3550_v28 = vpop.f32.mrf.mxu0 }
 0x225   :  { %v3572_v29 = vpop.f32.mrf.mxu1  ;;  %v3551_v6 = vadd.f32 %v3550_v28, %v3549_v25 }
 0x226   :  { %v3552_v30 = vpop.f32.mrf.mxu0  ;;  %v3573_v38 = vadd.f32 %v3572_v29, %v3571_v27 }
 0x227   :  { %v3574_v31 = vpop.f32.mrf.mxu1  ;;  %v2554_v7 = vadd.f32 %v3551_v6, %v493_v35 }
 0x228   :  { %v3553_v32 = vpop.f32.mrf.mxu0 }
 0x229   :  { %v3575_v33 = vpop.f32.mrf.mxu1  ;;  %v2594_v37 = vadd.f32 %v3573_v38, %v2554_v7 }
 0x242   :  { %v3593_v40 = vpop.f32.mrf.mxu0 }
 0x243   :  { %v3615_v41 = vpop.f32.mrf.mxu1 }
 0x244   :  { %v3594_v42 = vpop.f32.mrf.mxu0 }
 0x245   :  { %v3616_v36 = vpop.f32.mrf.mxu1  ;;  %v3595_v43 = vadd.f32 %v3594_v42, %v3593_v40 }
 0x246   :  { %v3596_v44 = vpop.f32.mrf.mxu0  ;;  %v3617_v46 = vadd.f32 %v3616_v36, %v3615_v41 }
 0x247   :  { %v3618_v26 = vpop.f32.mrf.mxu1  ;;  %v2634_v45 = vadd.f32 %v3595_v43, %v2594_v37 }
 0x248   :  { %v3597_v48 = vpop.f32.mrf.mxu0 }
 0x249   :  { %v3619_v49 = vpop.f32.mrf.mxu1  ;;  %v2674_v50 = vadd.f32 %v3617_v46, %v2634_v45 }
 0x24b   :  { %v2683_v52 = vmax.f32 %v2674_v50, 0.0 }
 0x24d   :  { %v2688_v21 = vpack.c.bf16 %v2683_v52, %v2683_v52 }
 0x24f   :  { %3691 = vmatmul.mubr.bf16.vlgmr.msra.gmra.mxu0 %v2688_v21 }
 0x262   :  { %v3637_v39 = vpop.f32.mrf.mxu0 }
 0x264   :  { %v3638_v53 = vpop.f32.mrf.mxu0 }
 0x265   :  { %v3639_v54 = vadd.f32 %v3638_v53, %v3637_v39 }
 0x266   :  { %v3640_v55 = vpop.f32.mrf.mxu0 }
 0x267   :  { %v3051_v1 = vadd.f32 %v3639_v54, %v3492_v63 }
 0x268   :  { %v3641_v58 = vpop.f32.mrf.mxu0 }
 0x2ce   :  { %v3659_v59 = vpop.f32.mrf.mxu1 }
 0x2d0   :  { %v3660_v60 = vpop.f32.mrf.mxu1 }
 0x2d1   :  { %v3661_v0 = vadd.f32 %v3660_v60, %v3659_v59 }
 0x2d2   :  { %v3662_v61 = vpop.f32.mrf.mxu1 }
 0x2d3   :  { %v3091_v2 = vadd.f32 %v3661_v0, %v3051_v1 }
 0x2d4   :  { %v3663_v62 = vpop.f32.mrf.mxu1 }
 0x30f   :  { %v3130_v3 = vpop.f32.mrf.mxu0 }
 0x310   :  { %v3131_v4 = vadd.f32 %v3130_v3, %v3091_v2 }
 0x311   :  { %v3692_v5 = vpop.f32.mrf.mxu0 }
 0x312   :  { %3136 = vmax.xlane.f32.xlu0 %v3131_v4 }
 0x313   :  { %v3133_v47 = vpop.f32.mrf.mxu0 }
 0x315   :  { %v3693_v51 = vpop.f32.mrf.mxu0 }
 0x39b   :  { %v3137_v56 = vpop.xlane.xlu0 %3136 }
 0x39c   :  { %v3138_v8 = vsub.f32 %v3131_v4, %v3137_v56 }
 0x39e   :  { %v3139_v9 = vmul.f32 1.442695, %v3138_v8 }
 0x3a0   :  { %4202 = vpow2.f32 %v3139_v9 }
 0x3ad   :  { %v4203_v10 = vpop.eup %4202 }
 0x3ae   :  { %3141 = vadd.xlane.f32.xlu0 %v4203_v10 }
 0x437   :  { %v3142_v11 = vpop.xlane.xlu0 %3141 }
 0x438   :  { %4204 = vlog2.f32 %v3142_v11 }
 0x445   :  { %v4205_v12 = vpop.eup %4204 }
 0x446   :  { %v3144_v13 = vmul.f32 0.6931472, %v4205_v12 }
 0x448   :  { %v3145_v14 = vsub.f32 %v3138_v8, %v3144_v13 }
 0x44a   :  { %3146 = vst [vmem:[#allocation11] sm:$0xff] %v3145_v14 }
 0x44b   :  { %4317 = shalt.err (!%p4314_p1)
}
 0x44c   :  { %3156 = dma.vmem_to_hbm [thread:$0]  %s3154_s4, 128, %s4476_s5, [#allocation4]  }
 0x44d   :  { %4332 = dma.done.wait [#allocation4], 128  }
 0x44e   :  { %4333 = vsyncadd [#allocation4], 4294967168 }
 0x44f   :  { %3160 = vsyncpa [#allocation3], 1 }
 0x450   :  { %3161 = vsyncpa [#allocation6], 1 }
 0x451   :  { %3162 = vsyncpa [#allocation9], 1 }
 0x452   :  { %3163 = vsyncpa [#allocation4], 1 }

</bundles_post_ra>
